<compile_context>
chip_gen: v5e
topology: v5e:2x2
jax: 0.10.0
libtpu: 0.0.40
codegen_flags: <defaults>
</compile_context>

<pallas_src>
import functools

import jax
import jax.numpy as jnp
from jax import lax
from jax.experimental import pallas as pl
from jax.experimental.pallas import tpu as pltpu

# ---------------- problem sizes (small, consistent with the module) ----------
B = 2                       # batch
C, Hh, Ww = 4, 16, 16
DIN = C * Hh * Ww           # 1024  (already a multiple of 128)
HID = 75                    # hidden width from the module
CLS = 10                    # classes
LANE = 128
SUBLANE = 8
HID_P = LANE                # padded hidden
CLS_P = LANE                # padded classes
N_HIDDEN_LAYERS = 13        # the 13 repeated Linear(75,75)+ReLU blocks
BN_EPS = 1e-5


# ---------------------------- Pallas kernel ----------------------------------
def mlp_deep_kernel(x_ref, w1_ref, b1_ref, gamma_ref, beta_ref,
                    wh_hbm, bh_ref, wo_hbm, bo_ref, o_ref,
                    wh_vmem, wo_vmem, sem, *, b_true):
    # x_ref:   (B_PAD, DIN)            f32  (pad rows are zero)
    # w1_ref:  (DIN, HID_P)            bf16 (padded cols are zero)
    # b1/gamma/beta: (1, HID_P)        f32  (padded lanes zero)
    # wh_hbm:  (13, HID_P, HID_P)      bf16, HBM (manual DMA)
    # bh_ref:  (13, 1, HID_P)          f32
    # wo_hbm:  (HID_P, CLS_P)          bf16, HBM (manual DMA)
    # bo_ref:  (1, CLS_P)              f32
    # o_ref:   (B_PAD, CLS_P)          f32
    # wh_vmem / wo_vmem: VMEM scratch for the manually-DMA'd weights.
    # sem:     DMA semaphores (2,)

    # Kick off hidden/output weight DMAs; they overlap the first matmul + BN.
    cp_wh = pltpu.make_async_copy(wh_hbm, wh_vmem, sem.at[0])
    cp_wh.start()
    cp_wo = pltpu.make_async_copy(wo_hbm, wo_vmem, sem.at[1])
    cp_wo.start()

    # Linear #0 : (B_PAD, 1024) @ (1024, 128) on the MXU, f32 accumulation.
    x = x_ref[...].astype(jnp.bfloat16)
    h = jnp.dot(x, w1_ref[...], preferred_element_type=jnp.float32) + b1_ref[...]

    # BatchNorm1d (training mode: batch mean, biased variance).
    # Pad rows of h equal b1 (bias was broadcast onto them), so they must be
    # masked out of the statistics; divide by the true batch count.
    row_ids = lax.broadcasted_iota(jnp.int32, h.shape, 0)
    valid = row_ids < b_true
    hm = jnp.where(valid, h, 0.0)
    inv_b = 1.0 / float(b_true)
    mean = jnp.sum(hm, axis=0, keepdims=True) * inv_b
    ex2 = jnp.sum(hm * hm, axis=0, keepdims=True) * inv_b
    var = ex2 - mean * mean
    # Fold the affine: padded lanes have gamma=beta=0 -> scale=shift=0 there.
    scale = gamma_ref[...] * lax.rsqrt(var + BN_EPS)
    shift = beta_ref[...] - mean * scale
    h = jnp.maximum(h * scale + shift, 0.0)     # BN + ReLU

    # Hidden/output weights must be resident from here on.
    cp_wh.wait()
    cp_wo.wait()

    # 13 x [Linear(75,75), ReLU]  (static unroll; one 128x128 MXU push each).
    for i in range(N_HIDDEN_LAYERS):
        h = jnp.dot(h.astype(jnp.bfloat16), wh_vmem[i],
                    preferred_element_type=jnp.float32) + bh_ref[i]
        h = jnp.maximum(h, 0.0)

    # Final Linear(75, classes).
    o_ref[...] = jnp.dot(h.astype(jnp.bfloat16), wo_vmem[...],
                         preferred_element_type=jnp.float32) + bo_ref[...]


# ------------------------------ wrapper ---------------------------------------
@jax.jit
def mlp_deep_forward(x_nchw, params):
    (w1, b1, gamma, beta, wh, bh, wo, bo) = params
    b = x_nchw.shape[0]
    b_pad = max(SUBLANE, -(-b // SUBLANE) * SUBLANE)   # round batch up to 8
    x_flat = x_nchw.reshape(b, -1)                     # same as torch .view(B, -1)
    x_pad = jnp.pad(x_flat, ((0, b_pad - b), (0, 0)))  # zero pad rows

    full = lambda shp: pl.BlockSpec(shp, lambda i: tuple(0 for _ in shp))
    hbm = pl.BlockSpec(memory_space=pl.ANY)            # raw HBM ref, manual DMA

    out_padded = pl.pallas_call(
        functools.partial(mlp_deep_kernel, b_true=b),
        out_shape=jax.ShapeDtypeStruct((b_pad, CLS_P), jnp.float32),
        grid=(1,),
        in_specs=[
            full((b_pad, DIN)),                        # x
            full((DIN, HID_P)),                        # w1 (bf16)
            full((1, HID_P)),                          # b1
            full((1, HID_P)),                          # gamma
            full((1, HID_P)),                          # beta
            hbm,                                       # wh (bf16, manual DMA)
            full((N_HIDDEN_LAYERS, 1, HID_P)),         # bh
            hbm,                                       # wo (bf16, manual DMA)
            full((1, CLS_P)),                          # bo
        ],
        out_specs=full((b_pad, CLS_P)),
        scratch_shapes=[
            pltpu.VMEM((N_HIDDEN_LAYERS, HID_P, HID_P), jnp.bfloat16),  # wh buf
            pltpu.VMEM((HID_P, CLS_P), jnp.bfloat16),                   # wo buf
            pltpu.SemaphoreType.DMA((2,)),
        ],
        compiler_params=pltpu.CompilerParams(
            dimension_semantics=("arbitrary",),
        ),
    )(x_pad, w1, b1, gamma, beta, wh, bh, wo, bo)

    return out_padded[:b, :CLS]   # strip batch + class padding


# ------------------------ deterministic parameter init ------------------------
def init_params(key):
    def pad_to(a, shape):
        out = jnp.zeros(shape, jnp.float32)
        return out.at[tuple(slice(0, s) for s in a.shape)].set(a)

    keys = jax.random.split(key, 4 + 2 * N_HIDDEN_LAYERS)
    kidx = 0

    # Linear(DIN, 75) — stored as (in, out); columns >= 75 are zero.
    scale1 = 1.0 / jnp.sqrt(jnp.float32(DIN))
    w1 = jax.random.uniform(keys[kidx], (DIN, HID), jnp.float32, -scale1, scale1); kidx += 1
    b1 = jax.random.uniform(keys[kidx], (HID,), jnp.float32, -scale1, scale1); kidx += 1
    w1 = pad_to(w1, (DIN, HID_P)).astype(jnp.bfloat16)
    b1 = pad_to(b1.reshape(1, HID), (1, HID_P))

    # BatchNorm1d(75): gamma=1, beta=0.  Pad lanes MUST stay zero (invariant
    # relied on by the kernel to keep padded lanes exactly zero).
    gamma = pad_to(jnp.ones((1, HID), jnp.float32), (1, HID_P))
    beta = jnp.zeros((1, HID_P), jnp.float32)

    # 13 x Linear(75, 75)
    scaleh = 1.0 / jnp.sqrt(jnp.float32(HID))
    wh_list, bh_list = [], []
    for _ in range(N_HIDDEN_LAYERS):
        w = jax.random.uniform(keys[kidx], (HID, HID), jnp.float32, -scaleh, scaleh); kidx += 1
        bb = jax.random.uniform(keys[kidx], (HID,), jnp.float32, -scaleh, scaleh); kidx += 1
        wh_list.append(pad_to(w, (HID_P, HID_P)))
        bh_list.append(pad_to(bb.reshape(1, HID), (1, HID_P)))
    wh = jnp.stack(wh_list, axis=0).astype(jnp.bfloat16)   # (13, HID_P, HID_P)
    bh = jnp.stack(bh_list, axis=0)                        # (13, 1, HID_P)

    # Linear(75, classes)
    wo = jax.random.uniform(keys[kidx], (HID, CLS), jnp.float32, -scaleh, scaleh); kidx += 1
    bo = jax.random.uniform(keys[kidx], (CLS,), jnp.float32, -scaleh, scaleh); kidx += 1
    wo = pad_to(wo, (HID_P, CLS_P)).astype(jnp.bfloat16)
    bo = pad_to(bo.reshape(1, CLS), (1, CLS_P))

    return (w1, b1, gamma, beta, wh, bh, wo, bo)


if __name__ == "__main__":
    key = jax.random.PRNGKey(0)
    kx, kp = jax.random.split(key)
    x = jax.random.normal(kx, (B, C, Hh, Ww), jnp.float32)
    params = init_params(kp)

    out = mlp_deep_forward(x, params)
    jax.block_until_ready(out)
    assert out.shape == (B, CLS), out.shape
    assert bool(jnp.all(jnp.isfinite(out)))
    print("KERNEL_OK")
</pallas_src>

<mosaic_0001>
module attributes {stable_mosaic.version = 11 : i64} {
  func.func @mlp_deep_kernel(%arg0: i32, %arg1: memref<8x1024xf32, #tpu.memory_space<vmem>>, %arg2: memref<1024x128xbf16, #tpu.memory_space<vmem>>, %arg3: memref<1x128xf32, #tpu.memory_space<vmem>>, %arg4: memref<1x128xf32, #tpu.memory_space<vmem>>, %arg5: memref<1x128xf32, #tpu.memory_space<vmem>>, %arg6: memref<13x128x128xbf16, #tpu.memory_space<any>>, %arg7: memref<13x1x128xf32, #tpu.memory_space<vmem>>, %arg8: memref<128x128xbf16, #tpu.memory_space<any>>, %arg9: memref<1x128xf32, #tpu.memory_space<vmem>>, %arg10: memref<8x128xf32, #tpu.memory_space<vmem>>, %arg11: memref<13x128x128xbf16, #tpu.memory_space<vmem>>, %arg12: memref<128x128xbf16, #tpu.memory_space<vmem>>, %arg13: memref<2x!tpu.dma_semaphore, #tpu.memory_space<semaphore_mem>>) attributes {dimension_semantics = [#tpu.dimension_semantics<arbitrary>], iteration_bounds = array<i64: 1>, scalar_prefetch = 0 : i64, scratch_operands = 3 : i64, tpu.core_type = #tpu.core_type<tc>, window_params = [{pipeline_mode = #tpu.pipeline_mode<synchronous>, transform_indices = @transform_0, window_bounds = array<i64: 8, 1024>}, {pipeline_mode = #tpu.pipeline_mode<synchronous>, transform_indices = @transform_1, window_bounds = array<i64: 1024, 128>}, {pipeline_mode = #tpu.pipeline_mode<synchronous>, transform_indices = @transform_2, window_bounds = array<i64: 1, 128>}, {pipeline_mode = #tpu.pipeline_mode<synchronous>, transform_indices = @transform_3, window_bounds = array<i64: 1, 128>}, {pipeline_mode = #tpu.pipeline_mode<synchronous>, transform_indices = @transform_4, window_bounds = array<i64: 1, 128>}, {}, {pipeline_mode = #tpu.pipeline_mode<synchronous>, transform_indices = @transform_6, window_bounds = array<i64: 13, 1, 128>}, {}, {pipeline_mode = #tpu.pipeline_mode<synchronous>, transform_indices = @transform_8, window_bounds = array<i64: 1, 128>}, {pipeline_mode = #tpu.pipeline_mode<synchronous>, transform_indices = @transform_9, window_bounds = array<i64: 8, 128>}]} {
    %c0_i32 = arith.constant 0 : i32
    %0 = tpu.memref_slice %arg13[%c0_i32] : memref<2x!tpu.dma_semaphore, #tpu.memory_space<semaphore_mem>> -> memref<1x!tpu.dma_semaphore, #tpu.memory_space<semaphore_mem>>
    %1 = tpu.memref_squeeze %0 : memref<1x!tpu.dma_semaphore, #tpu.memory_space<semaphore_mem>> -> memref<!tpu.dma_semaphore, #tpu.memory_space<semaphore_mem>>
    tpu.enqueue_dma source(%arg6 : memref<13x128x128xbf16, #tpu.memory_space<any>>) target(%arg11 : memref<13x128x128xbf16, #tpu.memory_space<vmem>>) target_semaphore(%1 : memref<!tpu.dma_semaphore, #tpu.memory_space<semaphore_mem>>)
    %c1_i32 = arith.constant 1 : i32
    %2 = tpu.memref_slice %arg13[%c1_i32] : memref<2x!tpu.dma_semaphore, #tpu.memory_space<semaphore_mem>> -> memref<1x!tpu.dma_semaphore, #tpu.memory_space<semaphore_mem>>
    %3 = tpu.memref_squeeze %2 : memref<1x!tpu.dma_semaphore, #tpu.memory_space<semaphore_mem>> -> memref<!tpu.dma_semaphore, #tpu.memory_space<semaphore_mem>>
    tpu.enqueue_dma source(%arg8 : memref<128x128xbf16, #tpu.memory_space<any>>) target(%arg12 : memref<128x128xbf16, #tpu.memory_space<vmem>>) target_semaphore(%3 : memref<!tpu.dma_semaphore, #tpu.memory_space<semaphore_mem>>)
    %c0 = arith.constant 0 : index
    %c0_0 = arith.constant 0 : index
    %4 = vector.load %arg1[%c0, %c0_0] : memref<8x1024xf32, #tpu.memory_space<vmem>>, vector<8x1024xf32>
    %5 = arith.truncf %4 : vector<8x1024xf32> to vector<8x1024xbf16>
    %c0_1 = arith.constant 0 : index
    %c0_2 = arith.constant 0 : index
    %6 = vector.load %arg2[%c0_1, %c0_2] : memref<1024x128xbf16, #tpu.memory_space<vmem>>, vector<1024x128xbf16>
    %cst = arith.constant dense<0.000000e+00> : vector<8x128xf32>
    %7 = tpu.matmul %5, %6, %cst {dimension_numbers = #tpu.dot_dimension_numbers<[1], [0], [0], [1], [0, 0, 1, 1], [], []>} : vector<8x1024xbf16>, vector<1024x128xbf16>, vector<8x128xf32> -> vector<8x128xf32>
    %c0_3 = arith.constant 0 : index
    %c0_4 = arith.constant 0 : index
    %8 = vector.load %arg3[%c0_3, %c0_4] : memref<1x128xf32, #tpu.memory_space<vmem>>, vector<1x128xf32>
    %9 = vector.broadcast %8 : vector<1x128xf32> to vector<8x128xf32>
    %10 = arith.addf %7, %9 : vector<8x128xf32>
    %11 = tpu.iota {dimensions = array<i32: 0>} : vector<8x128xi32>
    %c2_i32 = arith.constant 2 : i32
    %12 = vector.broadcast %c2_i32 : i32 to vector<8x128xi32>
    %13 = arith.cmpi slt, %11, %12 : vector<8x128xi32>
    %cst_5 = arith.constant 0.000000e+00 : f32
    %14 = vector.broadcast %cst_5 : f32 to vector<8x128xf32>
    %15 = arith.select %13, %10, %14 : vector<8x128xi1>, vector<8x128xf32>
    %cst_6 = arith.constant dense<0.000000e+00> : vector<128xf32>
    %16 = vector.multi_reduction <add>, %15, %cst_6 [0] : vector<8x128xf32> to vector<128xf32>
    %17 = vector.shape_cast %16 : vector<128xf32> to vector<1x128xf32>
    %cst_7 = arith.constant 5.000000e-01 : f32
    %18 = vector.broadcast %cst_7 : f32 to vector<1x128xf32>
    %19 = arith.mulf %17, %18 : vector<1x128xf32>
    %20 = arith.mulf %15, %15 : vector<8x128xf32>
    %cst_8 = arith.constant dense<0.000000e+00> : vector<128xf32>
    %21 = vector.multi_reduction <add>, %20, %cst_8 [0] : vector<8x128xf32> to vector<128xf32>
    %22 = vector.shape_cast %21 : vector<128xf32> to vector<1x128xf32>
    %cst_9 = arith.constant 5.000000e-01 : f32
    %23 = vector.broadcast %cst_9 : f32 to vector<1x128xf32>
    %24 = arith.mulf %22, %23 : vector<1x128xf32>
    %25 = arith.mulf %19, %19 : vector<1x128xf32>
    %26 = arith.subf %24, %25 : vector<1x128xf32>
    %c0_10 = arith.constant 0 : index
    %c0_11 = arith.constant 0 : index
    %27 = vector.load %arg4[%c0_10, %c0_11] : memref<1x128xf32, #tpu.memory_space<vmem>>, vector<1x128xf32>
    %cst_12 = arith.constant 9.99999974E-6 : f32
    %28 = vector.broadcast %cst_12 : f32 to vector<1x128xf32>
    %29 = arith.addf %26, %28 : vector<1x128xf32>
    %30 = math.rsqrt %29 : vector<1x128xf32>
    %31 = arith.mulf %27, %30 : vector<1x128xf32>
    %c0_13 = arith.constant 0 : index
    %c0_14 = arith.constant 0 : index
    %32 = vector.load %arg5[%c0_13, %c0_14] : memref<1x128xf32, #tpu.memory_space<vmem>>, vector<1x128xf32>
    %33 = arith.mulf %19, %31 : vector<1x128xf32>
    %34 = arith.subf %32, %33 : vector<1x128xf32>
    %35 = vector.broadcast %31 : vector<1x128xf32> to vector<8x128xf32>
    %36 = arith.mulf %10, %35 : vector<8x128xf32>
    %37 = vector.broadcast %34 : vector<1x128xf32> to vector<8x128xf32>
    %38 = arith.addf %36, %37 : vector<8x128xf32>
    %cst_15 = arith.constant 0.000000e+00 : f32
    %39 = vector.broadcast %cst_15 : f32 to vector<8x128xf32>
    %40 = arith.maximumf %38, %39 : vector<8x128xf32>
    %c0_i32_16 = arith.constant 0 : i32
    %41 = tpu.memref_slice %arg13[%c0_i32_16] : memref<2x!tpu.dma_semaphore, #tpu.memory_space<semaphore_mem>> -> memref<1x!tpu.dma_semaphore, #tpu.memory_space<semaphore_mem>>
    %42 = tpu.memref_squeeze %41 : memref<1x!tpu.dma_semaphore, #tpu.memory_space<semaphore_mem>> -> memref<!tpu.dma_semaphore, #tpu.memory_space<semaphore_mem>>
    tpu.wait_dma2 semaphore(%42 : memref<!tpu.dma_semaphore, #tpu.memory_space<semaphore_mem>>) src(%arg6 : memref<13x128x128xbf16, #tpu.memory_space<any>>) dst(%arg11 : memref<13x128x128xbf16, #tpu.memory_space<vmem>>)
    %c1_i32_17 = arith.constant 1 : i32
    %43 = tpu.memref_slice %arg13[%c1_i32_17] : memref<2x!tpu.dma_semaphore, #tpu.memory_space<semaphore_mem>> -> memref<1x!tpu.dma_semaphore, #tpu.memory_space<semaphore_mem>>
    %44 = tpu.memref_squeeze %43 : memref<1x!tpu.dma_semaphore, #tpu.memory_space<semaphore_mem>> -> memref<!tpu.dma_semaphore, #tpu.memory_space<semaphore_mem>>
    tpu.wait_dma2 semaphore(%44 : memref<!tpu.dma_semaphore, #tpu.memory_space<semaphore_mem>>) src(%arg8 : memref<128x128xbf16, #tpu.memory_space<any>>) dst(%arg12 : memref<128x128xbf16, #tpu.memory_space<vmem>>)
    %45 = arith.truncf %40 : vector<8x128xf32> to vector<8x128xbf16>
    %c0_18 = arith.constant 0 : index
    %c0_19 = arith.constant 0 : index
    %c0_20 = arith.constant 0 : index
    %46 = vector.load %arg11[%c0_18, %c0_19, %c0_20] : memref<13x128x128xbf16, #tpu.memory_space<vmem>>, vector<1x128x128xbf16>
    %47 = vector.shape_cast %46 : vector<1x128x128xbf16> to vector<128x128xbf16>
    %cst_21 = arith.constant dense<0.000000e+00> : vector<8x128xf32>
    %48 = tpu.matmul %45, %47, %cst_21 {dimension_numbers = #tpu.dot_dimension_numbers<[1], [0], [0], [1], [0, 0, 1, 1], [], []>} : vector<8x128xbf16>, vector<128x128xbf16>, vector<8x128xf32> -> vector<8x128xf32>
    %c0_22 = arith.constant 0 : index
    %c0_23 = arith.constant 0 : index
    %c0_24 = arith.constant 0 : index
    %49 = vector.load %arg7[%c0_22, %c0_23, %c0_24] : memref<13x1x128xf32, #tpu.memory_space<vmem>>, vector<1x1x128xf32>
    %50 = vector.shape_cast %49 : vector<1x1x128xf32> to vector<1x128xf32>
    %51 = vector.broadcast %50 : vector<1x128xf32> to vector<8x128xf32>
    %52 = arith.addf %48, %51 : vector<8x128xf32>
    %cst_25 = arith.constant 0.000000e+00 : f32
    %53 = vector.broadcast %cst_25 : f32 to vector<8x128xf32>
    %54 = arith.maximumf %52, %53 : vector<8x128xf32>
    %55 = arith.truncf %54 : vector<8x128xf32> to vector<8x128xbf16>
    %c1 = arith.constant 1 : index
    %c0_26 = arith.constant 0 : index
    %c0_27 = arith.constant 0 : index
    %56 = vector.load %arg11[%c1, %c0_26, %c0_27] : memref<13x128x128xbf16, #tpu.memory_space<vmem>>, vector<1x128x128xbf16>
    %57 = vector.shape_cast %56 : vector<1x128x128xbf16> to vector<128x128xbf16>
    %cst_28 = arith.constant dense<0.000000e+00> : vector<8x128xf32>
    %58 = tpu.matmul %55, %57, %cst_28 {dimension_numbers = #tpu.dot_dimension_numbers<[1], [0], [0], [1], [0, 0, 1, 1], [], []>} : vector<8x128xbf16>, vector<128x128xbf16>, vector<8x128xf32> -> vector<8x128xf32>
    %c1_29 = arith.constant 1 : index
    %c0_30 = arith.constant 0 : index
    %c0_31 = arith.constant 0 : index
    %59 = vector.load %arg7[%c1_29, %c0_30, %c0_31] : memref<13x1x128xf32, #tpu.memory_space<vmem>>, vector<1x1x128xf32>
    %60 = vector.shape_cast %59 : vector<1x1x128xf32> to vector<1x128xf32>
    %61 = vector.broadcast %60 : vector<1x128xf32> to vector<8x128xf32>
    %62 = arith.addf %58, %61 : vector<8x128xf32>
    %cst_32 = arith.constant 0.000000e+00 : f32
    %63 = vector.broadcast %cst_32 : f32 to vector<8x128xf32>
    %64 = arith.maximumf %62, %63 : vector<8x128xf32>
    %65 = arith.truncf %64 : vector<8x128xf32> to vector<8x128xbf16>
    %c2 = arith.constant 2 : index
    %c0_33 = arith.constant 0 : index
    %c0_34 = arith.constant 0 : index
    %66 = vector.load %arg11[%c2, %c0_33, %c0_34] : memref<13x128x128xbf16, #tpu.memory_space<vmem>>, vector<1x128x128xbf16>
    %67 = vector.shape_cast %66 : vector<1x128x128xbf16> to vector<128x128xbf16>
    %cst_35 = arith.constant dense<0.000000e+00> : vector<8x128xf32>
    %68 = tpu.matmul %65, %67, %cst_35 {dimension_numbers = #tpu.dot_dimension_numbers<[1], [0], [0], [1], [0, 0, 1, 1], [], []>} : vector<8x128xbf16>, vector<128x128xbf16>, vector<8x128xf32> -> vector<8x128xf32>
    %c2_36 = arith.constant 2 : index
    %c0_37 = arith.constant 0 : index
    %c0_38 = arith.constant 0 : index
    %69 = vector.load %arg7[%c2_36, %c0_37, %c0_38] : memref<13x1x128xf32, #tpu.memory_space<vmem>>, vector<1x1x128xf32>
    %70 = vector.shape_cast %69 : vector<1x1x128xf32> to vector<1x128xf32>
    %71 = vector.broadcast %70 : vector<1x128xf32> to vector<8x128xf32>
    %72 = arith.addf %68, %71 : vector<8x128xf32>
    %cst_39 = arith.constant 0.000000e+00 : f32
    %73 = vector.broadcast %cst_39 : f32 to vector<8x128xf32>
    %74 = arith.maximumf %72, %73 : vector<8x128xf32>
    %75 = arith.truncf %74 : vector<8x128xf32> to vector<8x128xbf16>
    %c3 = arith.constant 3 : index
    %c0_40 = arith.constant 0 : index
    %c0_41 = arith.constant 0 : index
    %76 = vector.load %arg11[%c3, %c0_40, %c0_41] : memref<13x128x128xbf16, #tpu.memory_space<vmem>>, vector<1x128x128xbf16>
    %77 = vector.shape_cast %76 : vector<1x128x128xbf16> to vector<128x128xbf16>
    %cst_42 = arith.constant dense<0.000000e+00> : vector<8x128xf32>
    %78 = tpu.matmul %75, %77, %cst_42 {dimension_numbers = #tpu.dot_dimension_numbers<[1], [0], [0], [1], [0, 0, 1, 1], [], []>} : vector<8x128xbf16>, vector<128x128xbf16>, vector<8x128xf32> -> vector<8x128xf32>
    %c3_43 = arith.constant 3 : index
    %c0_44 = arith.constant 0 : index
    %c0_45 = arith.constant 0 : index
    %79 = vector.load %arg7[%c3_43, %c0_44, %c0_45] : memref<13x1x128xf32, #tpu.memory_space<vmem>>, vector<1x1x128xf32>
    %80 = vector.shape_cast %79 : vector<1x1x128xf32> to vector<1x128xf32>
    %81 = vector.broadcast %80 : vector<1x128xf32> to vector<8x128xf32>
    %82 = arith.addf %78, %81 : vector<8x128xf32>
    %cst_46 = arith.constant 0.000000e+00 : f32
    %83 = vector.broadcast %cst_46 : f32 to vector<8x128xf32>
    %84 = arith.maximumf %82, %83 : vector<8x128xf32>
    %85 = arith.truncf %84 : vector<8x128xf32> to vector<8x128xbf16>
    %c4 = arith.constant 4 : index
    %c0_47 = arith.constant 0 : index
    %c0_48 = arith.constant 0 : index
    %86 = vector.load %arg11[%c4, %c0_47, %c0_48] : memref<13x128x128xbf16, #tpu.memory_space<vmem>>, vector<1x128x128xbf16>
    %87 = vector.shape_cast %86 : vector<1x128x128xbf16> to vector<128x128xbf16>
    %cst_49 = arith.constant dense<0.000000e+00> : vector<8x128xf32>
    %88 = tpu.matmul %85, %87, %cst_49 {dimension_numbers = #tpu.dot_dimension_numbers<[1], [0], [0], [1], [0, 0, 1, 1], [], []>} : vector<8x128xbf16>, vector<128x128xbf16>, vector<8x128xf32> -> vector<8x128xf32>
    %c4_50 = arith.constant 4 : index
    %c0_51 = arith.constant 0 : index
    %c0_52 = arith.constant 0 : index
    %89 = vector.load %arg7[%c4_50, %c0_51, %c0_52] : memref<13x1x128xf32, #tpu.memory_space<vmem>>, vector<1x1x128xf32>
    %90 = vector.shape_cast %89 : vector<1x1x128xf32> to vector<1x128xf32>
    %91 = vector.broadcast %90 : vector<1x128xf32> to vector<8x128xf32>
    %92 = arith.addf %88, %91 : vector<8x128xf32>
    %cst_53 = arith.constant 0.000000e+00 : f32
    %93 = vector.broadcast %cst_53 : f32 to vector<8x128xf32>
    %94 = arith.maximumf %92, %93 : vector<8x128xf32>
    %95 = arith.truncf %94 : vector<8x128xf32> to vector<8x128xbf16>
    %c5 = arith.constant 5 : index
    %c0_54 = arith.constant 0 : index
    %c0_55 = arith.constant 0 : index
    %96 = vector.load %arg11[%c5, %c0_54, %c0_55] : memref<13x128x128xbf16, #tpu.memory_space<vmem>>, vector<1x128x128xbf16>
    %97 = vector.shape_cast %96 : vector<1x128x128xbf16> to vector<128x128xbf16>
    %cst_56 = arith.constant dense<0.000000e+00> : vector<8x128xf32>
    %98 = tpu.matmul %95, %97, %cst_56 {dimension_numbers = #tpu.dot_dimension_numbers<[1], [0], [0], [1], [0, 0, 1, 1], [], []>} : vector<8x128xbf16>, vector<128x128xbf16>, vector<8x128xf32> -> vector<8x128xf32>
    %c5_57 = arith.constant 5 : index
    %c0_58 = arith.constant 0 : index
    %c0_59 = arith.constant 0 : index
    %99 = vector.load %arg7[%c5_57, %c0_58, %c0_59] : memref<13x1x128xf32, #tpu.memory_space<vmem>>, vector<1x1x128xf32>
    %100 = vector.shape_cast %99 : vector<1x1x128xf32> to vector<1x128xf32>
    %101 = vector.broadcast %100 : vector<1x128xf32> to vector<8x128xf32>
    %102 = arith.addf %98, %101 : vector<8x128xf32>
    %cst_60 = arith.constant 0.000000e+00 : f32
    %103 = vector.broadcast %cst_60 : f32 to vector<8x128xf32>
    %104 = arith.maximumf %102, %103 : vector<8x128xf32>
    %105 = arith.truncf %104 : vector<8x128xf32> to vector<8x128xbf16>
    %c6 = arith.constant 6 : index
    %c0_61 = arith.constant 0 : index
    %c0_62 = arith.constant 0 : index
    %106 = vector.load %arg11[%c6, %c0_61, %c0_62] : memref<13x128x128xbf16, #tpu.memory_space<vmem>>, vector<1x128x128xbf16>
    %107 = vector.shape_cast %106 : vector<1x128x128xbf16> to vector<128x128xbf16>
    %cst_63 = arith.constant dense<0.000000e+00> : vector<8x128xf32>
    %108 = tpu.matmul %105, %107, %cst_63 {dimension_numbers = #tpu.dot_dimension_numbers<[1], [0], [0], [1], [0, 0, 1, 1], [], []>} : vector<8x128xbf16>, vector<128x128xbf16>, vector<8x128xf32> -> vector<8x128xf32>
    %c6_64 = arith.constant 6 : index
    %c0_65 = arith.constant 0 : index
    %c0_66 = arith.constant 0 : index
    %109 = vector.load %arg7[%c6_64, %c0_65, %c0_66] : memref<13x1x128xf32, #tpu.memory_space<vmem>>, vector<1x1x128xf32>
    %110 = vector.shape_cast %109 : vector<1x1x128xf32> to vector<1x128xf32>
    %111 = vector.broadcast %110 : vector<1x128xf32> to vector<8x128xf32>
    %112 = arith.addf %108, %111 : vector<8x128xf32>
    %cst_67 = arith.constant 0.000000e+00 : f32
    %113 = vector.broadcast %cst_67 : f32 to vector<8x128xf32>
    %114 = arith.maximumf %112, %113 : vector<8x128xf32>
    %115 = arith.truncf %114 : vector<8x128xf32> to vector<8x128xbf16>
    %c7 = arith.constant 7 : index
    %c0_68 = arith.constant 0 : index
    %c0_69 = arith.constant 0 : index
    %116 = vector.load %arg11[%c7, %c0_68, %c0_69] : memref<13x128x128xbf16, #tpu.memory_space<vmem>>, vector<1x128x128xbf16>
    %117 = vector.shape_cast %116 : vector<1x128x128xbf16> to vector<128x128xbf16>
    %cst_70 = arith.constant dense<0.000000e+00> : vector<8x128xf32>
    %118 = tpu.matmul %115, %117, %cst_70 {dimension_numbers = #tpu.dot_dimension_numbers<[1], [0], [0], [1], [0, 0, 1, 1], [], []>} : vector<8x128xbf16>, vector<128x128xbf16>, vector<8x128xf32> -> vector<8x128xf32>
    %c7_71 = arith.constant 7 : index
    %c0_72 = arith.constant 0 : index
    %c0_73 = arith.constant 0 : index
    %119 = vector.load %arg7[%c7_71, %c0_72, %c0_73] : memref<13x1x128xf32, #tpu.memory_space<vmem>>, vector<1x1x128xf32>
    %120 = vector.shape_cast %119 : vector<1x1x128xf32> to vector<1x128xf32>
    %121 = vector.broadcast %120 : vector<1x128xf32> to vector<8x128xf32>
    %122 = arith.addf %118, %121 : vector<8x128xf32>
    %cst_74 = arith.constant 0.000000e+00 : f32
    %123 = vector.broadcast %cst_74 : f32 to vector<8x128xf32>
    %124 = arith.maximumf %122, %123 : vector<8x128xf32>
    %125 = arith.truncf %124 : vector<8x128xf32> to vector<8x128xbf16>
    %c8 = arith.constant 8 : index
    %c0_75 = arith.constant 0 : index
    %c0_76 = arith.constant 0 : index
    %126 = vector.load %arg11[%c8, %c0_75, %c0_76] : memref<13x128x128xbf16, #tpu.memory_space<vmem>>, vector<1x128x128xbf16>
    %127 = vector.shape_cast %126 : vector<1x128x128xbf16> to vector<128x128xbf16>
    %cst_77 = arith.constant dense<0.000000e+00> : vector<8x128xf32>
    %128 = tpu.matmul %125, %127, %cst_77 {dimension_numbers = #tpu.dot_dimension_numbers<[1], [0], [0], [1], [0, 0, 1, 1], [], []>} : vector<8x128xbf16>, vector<128x128xbf16>, vector<8x128xf32> -> vector<8x128xf32>
    %c8_78 = arith.constant 8 : index
    %c0_79 = arith.constant 0 : index
    %c0_80 = arith.constant 0 : index
    %129 = vector.load %arg7[%c8_78, %c0_79, %c0_80] : memref<13x1x128xf32, #tpu.memory_space<vmem>>, vector<1x1x128xf32>
    %130 = vector.shape_cast %129 : vector<1x1x128xf32> to vector<1x128xf32>
    %131 = vector.broadcast %130 : vector<1x128xf32> to vector<8x128xf32>
    %132 = arith.addf %128, %131 : vector<8x128xf32>
    %cst_81 = arith.constant 0.000000e+00 : f32
    %133 = vector.broadcast %cst_81 : f32 to vector<8x128xf32>
    %134 = arith.maximumf %132, %133 : vector<8x128xf32>
    %135 = arith.truncf %134 : vector<8x128xf32> to vector<8x128xbf16>
    %c9 = arith.constant 9 : index
    %c0_82 = arith.constant 0 : index
    %c0_83 = arith.constant 0 : index
    %136 = vector.load %arg11[%c9, %c0_82, %c0_83] : memref<13x128x128xbf16, #tpu.memory_space<vmem>>, vector<1x128x128xbf16>
    %137 = vector.shape_cast %136 : vector<1x128x128xbf16> to vector<128x128xbf16>
    %cst_84 = arith.constant dense<0.000000e+00> : vector<8x128xf32>
    %138 = tpu.matmul %135, %137, %cst_84 {dimension_numbers = #tpu.dot_dimension_numbers<[1], [0], [0], [1], [0, 0, 1, 1], [], []>} : vector<8x128xbf16>, vector<128x128xbf16>, vector<8x128xf32> -> vector<8x128xf32>
    %c9_85 = arith.constant 9 : index
    %c0_86 = arith.constant 0 : index
    %c0_87 = arith.constant 0 : index
    %139 = vector.load %arg7[%c9_85, %c0_86, %c0_87] : memref<13x1x128xf32, #tpu.memory_space<vmem>>, vector<1x1x128xf32>
    %140 = vector.shape_cast %139 : vector<1x1x128xf32> to vector<1x128xf32>
    %141 = vector.broadcast %140 : vector<1x128xf32> to vector<8x128xf32>
    %142 = arith.addf %138, %141 : vector<8x128xf32>
    %cst_88 = arith.constant 0.000000e+00 : f32
    %143 = vector.broadcast %cst_88 : f32 to vector<8x128xf32>
    %144 = arith.maximumf %142, %143 : vector<8x128xf32>
    %145 = arith.truncf %144 : vector<8x128xf32> to vector<8x128xbf16>
    %c10 = arith.constant 10 : index
    %c0_89 = arith.constant 0 : index
    %c0_90 = arith.constant 0 : index
    %146 = vector.load %arg11[%c10, %c0_89, %c0_90] : memref<13x128x128xbf16, #tpu.memory_space<vmem>>, vector<1x128x128xbf16>
    %147 = vector.shape_cast %146 : vector<1x128x128xbf16> to vector<128x128xbf16>
    %cst_91 = arith.constant dense<0.000000e+00> : vector<8x128xf32>
    %148 = tpu.matmul %145, %147, %cst_91 {dimension_numbers = #tpu.dot_dimension_numbers<[1], [0], [0], [1], [0, 0, 1, 1], [], []>} : vector<8x128xbf16>, vector<128x128xbf16>, vector<8x128xf32> -> vector<8x128xf32>
    %c10_92 = arith.constant 10 : index
    %c0_93 = arith.constant 0 : index
    %c0_94 = arith.constant 0 : index
    %149 = vector.load %arg7[%c10_92, %c0_93, %c0_94] : memref<13x1x128xf32, #tpu.memory_space<vmem>>, vector<1x1x128xf32>
    %150 = vector.shape_cast %149 : vector<1x1x128xf32> to vector<1x128xf32>
    %151 = vector.broadcast %150 : vector<1x128xf32> to vector<8x128xf32>
    %152 = arith.addf %148, %151 : vector<8x128xf32>
    %cst_95 = arith.constant 0.000000e+00 : f32
    %153 = vector.broadcast %cst_95 : f32 to vector<8x128xf32>
    %154 = arith.maximumf %152, %153 : vector<8x128xf32>
    %155 = arith.truncf %154 : vector<8x128xf32> to vector<8x128xbf16>
    %c11 = arith.constant 11 : index
    %c0_96 = arith.constant 0 : index
    %c0_97 = arith.constant 0 : index
    %156 = vector.load %arg11[%c11, %c0_96, %c0_97] : memref<13x128x128xbf16, #tpu.memory_space<vmem>>, vector<1x128x128xbf16>
    %157 = vector.shape_cast %156 : vector<1x128x128xbf16> to vector<128x128xbf16>
    %cst_98 = arith.constant dense<0.000000e+00> : vector<8x128xf32>
    %158 = tpu.matmul %155, %157, %cst_98 {dimension_numbers = #tpu.dot_dimension_numbers<[1], [0], [0], [1], [0, 0, 1, 1], [], []>} : vector<8x128xbf16>, vector<128x128xbf16>, vector<8x128xf32> -> vector<8x128xf32>
    %c11_99 = arith.constant 11 : index
    %c0_100 = arith.constant 0 : index
    %c0_101 = arith.constant 0 : index
    %159 = vector.load %arg7[%c11_99, %c0_100, %c0_101] : memref<13x1x128xf32, #tpu.memory_space<vmem>>, vector<1x1x128xf32>
    %160 = vector.shape_cast %159 : vector<1x1x128xf32> to vector<1x128xf32>
    %161 = vector.broadcast %160 : vector<1x128xf32> to vector<8x128xf32>
    %162 = arith.addf %158, %161 : vector<8x128xf32>
    %cst_102 = arith.constant 0.000000e+00 : f32
    %163 = vector.broadcast %cst_102 : f32 to vector<8x128xf32>
    %164 = arith.maximumf %162, %163 : vector<8x128xf32>
    %165 = arith.truncf %164 : vector<8x128xf32> to vector<8x128xbf16>
    %c12 = arith.constant 12 : index
    %c0_103 = arith.constant 0 : index
    %c0_104 = arith.constant 0 : index
    %166 = vector.load %arg11[%c12, %c0_103, %c0_104] : memref<13x128x128xbf16, #tpu.memory_space<vmem>>, vector<1x128x128xbf16>
    %167 = vector.shape_cast %166 : vector<1x128x128xbf16> to vector<128x128xbf16>
    %cst_105 = arith.constant dense<0.000000e+00> : vector<8x128xf32>
    %168 = tpu.matmul %165, %167, %cst_105 {dimension_numbers = #tpu.dot_dimension_numbers<[1], [0], [0], [1], [0, 0, 1, 1], [], []>} : vector<8x128xbf16>, vector<128x128xbf16>, vector<8x128xf32> -> vector<8x128xf32>
    %c12_106 = arith.constant 12 : index
    %c0_107 = arith.constant 0 : index
    %c0_108 = arith.constant 0 : index
    %169 = vector.load %arg7[%c12_106, %c0_107, %c0_108] : memref<13x1x128xf32, #tpu.memory_space<vmem>>, vector<1x1x128xf32>
    %170 = vector.shape_cast %169 : vector<1x1x128xf32> to vector<1x128xf32>
    %171 = vector.broadcast %170 : vector<1x128xf32> to vector<8x128xf32>
    %172 = arith.addf %168, %171 : vector<8x128xf32>
    %cst_109 = arith.constant 0.000000e+00 : f32
    %173 = vector.broadcast %cst_109 : f32 to vector<8x128xf32>
    %174 = arith.maximumf %172, %173 : vector<8x128xf32>
    %175 = arith.truncf %174 : vector<8x128xf32> to vector<8x128xbf16>
    %c0_110 = arith.constant 0 : index
    %c0_111 = arith.constant 0 : index
    %176 = vector.load %arg12[%c0_110, %c0_111] : memref<128x128xbf16, #tpu.memory_space<vmem>>, vector<128x128xbf16>
    %cst_112 = arith.constant dense<0.000000e+00> : vector<8x128xf32>
    %177 = tpu.matmul %175, %176, %cst_112 {dimension_numbers = #tpu.dot_dimension_numbers<[1], [0], [0], [1], [0, 0, 1, 1], [], []>} : vector<8x128xbf16>, vector<128x128xbf16>, vector<8x128xf32> -> vector<8x128xf32>
    %c0_113 = arith.constant 0 : index
    %c0_114 = arith.constant 0 : index
    %178 = vector.load %arg9[%c0_113, %c0_114] : memref<1x128xf32, #tpu.memory_space<vmem>>, vector<1x128xf32>
    %179 = vector.broadcast %178 : vector<1x128xf32> to vector<8x128xf32>
    %180 = arith.addf %177, %179 : vector<8x128xf32>
    %c0_115 = arith.constant 0 : index
    %c0_116 = arith.constant 0 : index
    %181 = vector.load %arg10[%c0_115, %c0_116] : memref<8x128xf32, #tpu.memory_space<vmem>>, vector<8x128xf32>
    tpu.vector_store %arg10[%c0_115, %c0_116], %180 {strides = array<i32>} : memref<8x128xf32, #tpu.memory_space<vmem>>, vector<8x128xf32>,
    return
  }
  func.func @transform_0(%arg0: i32) -> (i32, i32) {
    %c0_i32 = arith.constant 0 : i32
    %c0_i32_0 = arith.constant 0 : i32
    %c0_i32_1 = arith.constant 0 : i32
    return %c0_i32, %c0_i32_0 : i32, i32
  }
  func.func @transform_1(%arg0: i32) -> (i32, i32) {
    %c0_i32 = arith.constant 0 : i32
    %c0_i32_0 = arith.constant 0 : i32
    %c0_i32_1 = arith.constant 0 : i32
    return %c0_i32, %c0_i32_0 : i32, i32
  }
  func.func @transform_2(%arg0: i32) -> (i32, i32) {
    %c0_i32 = arith.constant 0 : i32
    %c0_i32_0 = arith.constant 0 : i32
    %c0_i32_1 = arith.constant 0 : i32
    return %c0_i32, %c0_i32_0 : i32, i32
  }
  func.func @transform_3(%arg0: i32) -> (i32, i32) {
    %c0_i32 = arith.constant 0 : i32
    %c0_i32_0 = arith.constant 0 : i32
    %c0_i32_1 = arith.constant 0 : i32
    return %c0_i32, %c0_i32_0 : i32, i32
  }
  func.func @transform_4(%arg0: i32) -> (i32, i32) {
    %c0_i32 = arith.constant 0 : i32
    %c0_i32_0 = arith.constant 0 : i32
    %c0_i32_1 = arith.constant 0 : i32
    return %c0_i32, %c0_i32_0 : i32, i32
  }
  func.func @transform_6(%arg0: i32) -> (i32, i32, i32) {
    %c0_i32 = arith.constant 0 : i32
    %c0_i32_0 = arith.constant 0 : i32
    %c0_i32_1 = arith.constant 0 : i32
    %c0_i32_2 = arith.constant 0 : i32
    return %c0_i32, %c0_i32_0, %c0_i32_1 : i32, i32, i32
  }
  func.func @transform_8(%arg0: i32) -> (i32, i32) {
    %c0_i32 = arith.constant 0 : i32
    %c0_i32_0 = arith.constant 0 : i32
    %c0_i32_1 = arith.constant 0 : i32
    return %c0_i32, %c0_i32_0 : i32, i32
  }
  func.func @transform_9(%arg0: i32) -> (i32, i32) {
    %c0_i32 = arith.constant 0 : i32
    %c0_i32_0 = arith.constant 0 : i32
    %c0_i32_1 = arith.constant 0 : i32
    return %c0_i32, %c0_i32_0 : i32, i32
  }
}

</mosaic_0001>

<bundles_post_ra>
// kernel: mlp_deep_forward.1
= control target key start
LH: loop header
LB: loop body
LE: loop exit
PB: predicated region body
PF: predicated region fallthrough
CT: control target
= control target key end

     0   :  { %14 = vsyncpa [#allocation6], 0  ;;  %s2958_s12 = smov [#allocation5]   ;;  %s2959_s14 = smov 64   ;;  %s3120_s0 = inlined_call_operand.vmem [shape: f32[8,1024], index: 0, kind: input, shape index: {}]   ;;  %s3121_s1 = inlined_call_operand.hbm [shape: bf16[1024,128], index: 1, kind: input, shape index: {}]   ;;  %s3122_s2 = inlined_call_operand.vmem [shape: f32[1,128], index: 2, kind: input, shape index: {}]   ;;  %s3123_s3 = inlined_call_operand.vmem [shape: f32[1,128], index: 3, kind: input, shape index: {}]   ;;  %s3124_s4 = inlined_call_operand.vmem [shape: f32[1,128], index: 4, kind: input, shape index: {}]   ;;  %s3125_s5 = inlined_call_operand.hbm [shape: bf16[13,128,128], index: 5, kind: input, shape index: {}]   ;;  %s3126_s6 = inlined_call_operand.vmem [shape: f32[13,1,128], index: 6, kind: input, shape index: {}]   ;;  %s3127_s7 = inlined_call_operand.vmem [shape: bf16[128,128], index: 7, kind: input, shape index: {}]   ;;  %s3128_s8 = inlined_call_operand.vmem [shape: f32[1,128], index: 8, kind: input, shape index: {}]   ;;  %s3129_s9 = inlined_call_operand.vmem [shape: f32[8,128], index: 9, kind: output, shape index: {}]  }
   0x1   :  { %s21_s11 = sshll.u32 %s3121_s1, 4  ;;  %s23_s13 = sshll.u32 %s2958_s12, 4  ;;  %s22_s11 = int_to_ptr.hbm [resolvable:$true] %s21_s11  ;;  %s24_s13 = int_to_ptr.vmem [resolvable:$true] %s23_s13 }
   0x2   :  { %s2960_s15 = smov 4  }
   0x3   :  { %29 = dma.hbm_to_vmem [thread:$0]  %s22_s11, 8192, %s24_s13, [#allocation6], %s2959_s14, %s2959_s14, %s2960_s15  }
   0x4   :  { %2952 = dma.done.wait [#allocation6], 8192  }
   0x5   :  { %2953 = vsyncadd [#allocation6], 4294959104  ;;  %s51_s18 = sshll.u32 %s3125_s5, 4  ;;  %s2961_s19 = smov [#allocation2]   ;;  %v68_v0 = vld [vmem:[%s3127_s7] sm:$0xff]  ;;  %v70_v1 = vld [vmem:[%s3127_s7 + $0x8] sm:$0xff]  ;;  %s52_s18 = int_to_ptr.hbm [resolvable:$true] %s51_s18 }
   0x6   :  { %s53_s20 = sshll.u32 %s2961_s19, 4  ;;  %v72_v2 = vld [vmem:[%s3127_s7 + $0x10] sm:$0xff]  ;;  %69 = vst [vmem:[#allocation3 + $0x30] sm:$0xff] %v68_v0  ;;  %v74_v3 = vld [vmem:[%s3127_s7 + $0x18] sm:$0xff]  ;;  %v76_v4 = vld [vmem:[%s3127_s7 + $0x20] sm:$0xff]  ;;  %s54_s20 = int_to_ptr.vmem [resolvable:$true] %s53_s20 }
   0x7   :  { %56 = dma.hbm_to_vmem [thread:$0]  %s52_s18, 13312, %s54_s20, [#allocation4]  ;;  %71 = vst [vmem:[#allocation3] sm:$0xff] %v70_v1  ;;  %v78_v5 = vld [vmem:[%s3127_s7 + $0x28] sm:$0xff]  ;;  %v80_v6 = vld [vmem:[%s3127_s7 + $0x30] sm:$0xff]  ;;  %v82_v7 = vld [vmem:[%s3127_s7 + $0x38] sm:$0xff] }
   0x8   :  { %73 = vst [vmem:[#allocation3 + $0x18] sm:$0xff] %v72_v2 }
   0x9   :  { %75 = vst [vmem:[#allocation3 + $0x10] sm:$0xff] %v74_v3 }
   0xa   :  { %77 = vst [vmem:[#allocation3 + $0x8] sm:$0xff] %v76_v4 }
   0xb   :  { %79 = vst [vmem:[#allocation3 + $0x20] sm:$0xff] %v78_v5 }
   0xc   :  { %81 = vst [vmem:[#allocation3 + $0x28] sm:$0xff] %v80_v6 }
   0xd   :  { %83 = vst [vmem:[#allocation3 + $0x38] sm:$0xff] %v82_v7 }
   0xe   :  { %89 = vsyncadd [#allocation4 + $0x1], 1024  ;;  %v2714_v8 = vld [vmem:[#allocation5 + $0x38] sm:$0xff]  ;;  %v2713_v12 = vld [vmem:[#allocation5 + $0x30] sm:$0xff] }
   0xf   :  { %v2722_v9 = vld [vmem:[#allocation5 + $0x78] sm:$0xff]  ;;  %622 = vmatpush.bf16.msra.mxu0 %v2714_v8  ;;  %v2721_v13 = vld [vmem:[#allocation5 + $0x70] sm:$0xff]  ;;  %v2712_v16 = vld [vmem:[#allocation5 + $0x28] sm:$0xff] }
  0x10   :  { %v2730_v10 = vld [vmem:[#allocation5 + $0xb8] sm:$0xff]  ;;  %635 = vmatpush.bf16.msra.mxu1 %v2722_v9  ;;  %v2729_v14 = vld [vmem:[#allocation5 + $0xb0] sm:$0xff]  ;;  %v2720_v17 = vld [vmem:[#allocation5 + $0x68] sm:$0xff] }
  0x11   :  { %v2738_v11 = vld [vmem:[#allocation5 + $0xf8] sm:$0xff]  ;;  %648 = vmatpush.bf16.msra.mxu2 %v2730_v10  ;;  %v2737_v15 = vld [vmem:[#allocation5 + $0xf0] sm:$0xff]  ;;  %v2728_v18 = vld [vmem:[#allocation5 + $0xa8] sm:$0xff] }
  0x12   :  { %661 = vmatpush.bf16.msra.mxu3 %v2738_v11  ;;  %v2736_v19 = vld [vmem:[#allocation5 + $0xe8] sm:$0xff]  ;;  %v2711_v20 = vld [vmem:[#allocation5 + $0x20] sm:$0xff]  ;;  %v2710_v24 = vld [vmem:[#allocation5 + $0x18] sm:$0xff] }
  0x13   :  { %623 = vmatpush.bf16.msra.mxu0 %v2713_v12  ;;  %v2719_v21 = vld [vmem:[#allocation5 + $0x60] sm:$0xff]  ;;  %v2718_v25 = vld [vmem:[#allocation5 + $0x58] sm:$0xff]  ;;  %v2709_v28 = vld [vmem:[#allocation5 + $0x10] sm:$0xff] }
  0x14   :  { %636 = vmatpush.bf16.msra.mxu1 %v2721_v13  ;;  %v2727_v22 = vld [vmem:[#allocation5 + $0xa0] sm:$0xff]  ;;  %v2726_v26 = vld [vmem:[#allocation5 + $0x98] sm:$0xff]  ;;  %v2717_v29 = vld [vmem:[#allocation5 + $0x50] sm:$0xff] }
  0x15   :  { %649 = vmatpush.bf16.msra.mxu2 %v2729_v14  ;;  %v2735_v23 = vld [vmem:[#allocation5 + $0xe0] sm:$0xff]  ;;  %v2734_v27 = vld [vmem:[#allocation5 + $0xd8] sm:$0xff]  ;;  %v2725_v30 = vld [vmem:[#allocation5 + $0x90] sm:$0xff] }
  0x16   :  { %662 = vmatpush.bf16.msra.mxu3 %v2737_v15  ;;  %v2733_v31 = vld [vmem:[#allocation5 + $0xd0] sm:$0xff]  ;;  %v2708_v32 = vld [vmem:[#allocation5 + $0x8] sm:$0xff]  ;;  %v2707_v36 = vld [vmem:[#allocation5] sm:$0xff] }
  0x17   :  { %624 = vmatpush.bf16.msra.mxu0 %v2712_v16  ;;  %v2716_v33 = vld [vmem:[#allocation5 + $0x48] sm:$0xff]  ;;  %v2715_v37 = vld [vmem:[#allocation5 + $0x40] sm:$0xff]  ;;  %v2746_v40 = vld [vmem:[#allocation5 + $0x138] sm:$0xff] }
  0x18   :  { %637 = vmatpush.bf16.msra.mxu1 %v2720_v17  ;;  %v2724_v34 = vld [vmem:[#allocation5 + $0x88] sm:$0xff]  ;;  %v2723_v38 = vld [vmem:[#allocation5 + $0x80] sm:$0xff]  ;;  %v92_v41 = vld [vmem:[%s3120_s0 + $0x10] sm:$0xff] }
  0x19   :  { %650 = vmatpush.bf16.msra.mxu2 %v2728_v18  ;;  %v2732_v35 = vld [vmem:[#allocation5 + $0xc8] sm:$0xff]  ;;  %v2731_v39 = vld [vmem:[#allocation5 + $0xc0] sm:$0xff]  ;;  %v2754_v43 = vld [vmem:[#allocation5 + $0x178] sm:$0xff]  ;;  %v100_v48 = vpack.c.bf16 %v92_v41, %v92_v41 }
  0x1a   :  { %663 = vmatpush.bf16.msra.mxu3 %v2736_v19  ;;  %v90_v42 = vld [vmem:[%s3120_s0] sm:$0xff]  ;;  %v93_v44 = vld [vmem:[%s3120_s0 + $0x18] sm:$0xff]  ;;  %v91_v45 = vld [vmem:[%s3120_s0 + $0x8] sm:$0xff] }
  0x1b   :  { %625 = vmatpush.bf16.msra.mxu0 %v2711_v20  ;;  %v2762_v46 = vld [vmem:[#allocation5 + $0x1b8] sm:$0xff]  ;;  %v98_v49 = vpack.c.bf16 %v90_v42, %v90_v42  ;;  %v101_v50 = vpack.c.bf16 %v93_v44, %v93_v44  ;;  %v99_v51 = vpack.c.bf16 %v91_v45, %v91_v45  ;;  %v2745_v52 = vld [vmem:[#allocation5 + $0x130] sm:$0xff]  ;;  %v2744_v56 = vld [vmem:[#allocation5 + $0x128] sm:$0xff] }
  0x1c   :  { %638 = vmatpush.bf16.msra.mxu1 %v2719_v21  ;;  %v2770_v47 = vld [vmem:[#allocation5 + $0x1f8] sm:$0xff]  ;;  %v2753_v53 = vld [vmem:[#allocation5 + $0x170] sm:$0xff]  ;;  %v2752_v57 = vld [vmem:[#allocation5 + $0x168] sm:$0xff] }
  0x1d   :  { %651 = vmatpush.bf16.msra.mxu2 %v2727_v22  ;;  %v2761_v54 = vld [vmem:[#allocation5 + $0x1b0] sm:$0xff]  ;;  %v2760_v58 = vld [vmem:[#allocation5 + $0x1a8] sm:$0xff]  ;;  %v2743_v60 = vld [vmem:[#allocation5 + $0x120] sm:$0xff] }
  0x1e   :  { %664 = vmatpush.bf16.msra.mxu3 %v2735_v23  ;;  %v2769_v55 = vld [vmem:[#allocation5 + $0x1f0] sm:$0xff]  ;;  %v2768_v59 = vld [vmem:[#allocation5 + $0x1e8] sm:$0xff]  ;;  %v2751_v61 = vld [vmem:[#allocation5 + $0x160] sm:$0xff] }
  0x1f   :  { %626 = vmatpush.bf16.msra.mxu0 %v2710_v24  ;;  %v2759_v62 = vld [vmem:[#allocation5 + $0x1a0] sm:$0xff]  ;;  %v2742_v0 = vld [vmem:[#allocation5 + $0x118] sm:$0xff]  ;;  %v2741_v4 = vld [vmem:[#allocation5 + $0x110] sm:$0xff] }
  0x20   :  { %639 = vmatpush.bf16.msra.mxu1 %v2718_v25  ;;  %v2767_v63 = vld [vmem:[#allocation5 + $0x1e0] sm:$0xff]  ;;  %v2750_v1 = vld [vmem:[#allocation5 + $0x158] sm:$0xff]  ;;  %v2749_v5 = vld [vmem:[#allocation5 + $0x150] sm:$0xff] }
  0x21   :  { %652 = vmatpush.bf16.msra.mxu2 %v2726_v26  ;;  %v2758_v2 = vld [vmem:[#allocation5 + $0x198] sm:$0xff]  ;;  %v2757_v6 = vld [vmem:[#allocation5 + $0x190] sm:$0xff]  ;;  %v2740_v8 = vld [vmem:[#allocation5 + $0x108] sm:$0xff] }
  0x22   :  { %665 = vmatpush.bf16.msra.mxu3 %v2734_v27  ;;  %v2766_v3 = vld [vmem:[#allocation5 + $0x1d8] sm:$0xff]  ;;  %v2765_v7 = vld [vmem:[#allocation5 + $0x1d0] sm:$0xff]  ;;  %v2748_v9 = vld [vmem:[#allocation5 + $0x148] sm:$0xff] }
  0x23   :  { %627 = vmatpush.bf16.msra.mxu0 %v2709_v28  ;;  %v2756_v10 = vld [vmem:[#allocation5 + $0x188] sm:$0xff]  ;;  %v2739_v12 = vld [vmem:[#allocation5 + $0x100] sm:$0xff]  ;;  %v96_v18 = vld [vmem:[%s3120_s0 + $0x30] sm:$0xff] }
  0x24   :  { %640 = vmatpush.bf16.msra.mxu1 %v2717_v29  ;;  %v2764_v11 = vld [vmem:[#allocation5 + $0x1c8] sm:$0xff]  ;;  %v2747_v13 = vld [vmem:[#allocation5 + $0x140] sm:$0xff]  ;;  %v97_v19 = vld [vmem:[%s3120_s0 + $0x38] sm:$0xff]  ;;  %v104_v22 = vpack.c.bf16 %v96_v18, %v96_v18 }
  0x25   :  { %653 = vmatpush.bf16.msra.mxu2 %v2725_v30  ;;  %v2755_v14 = vld [vmem:[#allocation5 + $0x180] sm:$0xff]  ;;  %v95_v16 = vld [vmem:[%s3120_s0 + $0x28] sm:$0xff]  ;;  %v105_v23 = vpack.c.bf16 %v97_v19, %v97_v19 }
  0x26   :  { %666 = vmatpush.bf16.msra.mxu3 %v2733_v31  ;;  %v94_v15 = vld [vmem:[%s3120_s0 + $0x20] sm:$0xff]  ;;  %v103_v21 = vpack.c.bf16 %v95_v16, %v95_v16 }
  0x27   :  { %628 = vmatpush.bf16.msra.mxu0 %v2708_v32  ;;  %v2763_v17 = vld [vmem:[#allocation5 + $0x1c0] sm:$0xff]  ;;  %v102_v20 = vpack.c.bf16 %v94_v15, %v94_v15 }
  0x28   :  { %641 = vmatpush.bf16.msra.mxu1 %v2716_v33  ;;  %v2887_v30 = vld [vmem:[%s3122_s2] ss:$0 sm:$0xff] }
  0x29   :  { %654 = vmatpush.bf16.msra.mxu2 %v2724_v34  ;;  %v760_v15 = vld [vmem:[%s3124_s4] sm:$0x1] }
  0x2a   :  { %667 = vmatpush.bf16.msra.mxu3 %v2732_v35 }
  0x2b   :  { %629 = vmatpush.bf16.msra.mxu0 %v2707_v36 }
  0x2c   :  { %642 = vmatpush.bf16.msra.mxu1 %v2715_v37 }
  0x2d   :  { %655 = vmatpush.bf16.msra.mxu2 %v2723_v38 }
  0x2e   :  { %668 = vmatpush.bf16.msra.mxu3 %v2731_v39  ;;  %630 = vmatmul.bf16.vlgmr.msra.gmra.mxu0 %v98_v49  ;;  %v726_v39 = vlaneseq }
  0x2f   :  { %674 = vmatpush.bf16.msrb.mxu0 %v2746_v40  ;;  %643 = vmatmul.bf16.vlgmr.msra.gmra.mxu1 %v99_v51 }
  0x30   :  { %687 = vmatpush.bf16.msrb.mxu1 %v2754_v43  ;;  %656 = vmatmul.bf16.vlgmr.msra.gmra.mxu2 %v100_v48  ;;  %v727_v41 = vshrl.u32 %v726_v39, 7 }
  0x31   :  { %700 = vmatpush.bf16.msrb.mxu2 %v2762_v46  ;;  %669 = vmatmul.bf16.vlgmr.msra.gmra.mxu3 %v101_v50 }
  0x32   :  { %713 = vmatpush.bf16.msrb.mxu3 %v2770_v47  ;;  %vm728_vm0 = vcmp.lt.s32.totalorder %v727_v41, 2 }
  0x33   :  { %675 = vmatpush.bf16.msrb.mxu0 %v2745_v52 }
  0x34   :  { %688 = vmatpush.bf16.msrb.mxu1 %v2753_v53 }
  0x35   :  { %701 = vmatpush.bf16.msrb.mxu2 %v2761_v54 }
  0x36   :  { %714 = vmatpush.bf16.msrb.mxu3 %v2769_v55 }
  0x37   :  { %676 = vmatpush.bf16.msrb.mxu0 %v2744_v56 }
  0x38   :  { %689 = vmatpush.bf16.msrb.mxu1 %v2752_v57 }
  0x39   :  { %702 = vmatpush.bf16.msrb.mxu2 %v2760_v58 }
  0x3a   :  { %715 = vmatpush.bf16.msrb.mxu3 %v2768_v59 }
  0x3b   :  { %677 = vmatpush.bf16.msrb.mxu0 %v2743_v60 }
  0x3c   :  { %690 = vmatpush.bf16.msrb.mxu1 %v2751_v61 }
  0x3d   :  { %703 = vmatpush.bf16.msrb.mxu2 %v2759_v62 }
  0x3e   :  { %716 = vmatpush.bf16.msrb.mxu3 %v2767_v63 }
  0x3f   :  { %678 = vmatpush.bf16.msrb.mxu0 %v2742_v0 }
  0x40   :  { %691 = vmatpush.bf16.msrb.mxu1 %v2750_v1 }
  0x41   :  { %704 = vmatpush.bf16.msrb.mxu2 %v2758_v2 }
  0x42   :  { %717 = vmatpush.bf16.msrb.mxu3 %v2766_v3 }
  0x43   :  { %679 = vmatpush.bf16.msrb.mxu0 %v2741_v4 }
  0x44   :  { %692 = vmatpush.bf16.msrb.mxu1 %v2749_v5 }
  0x45   :  { %705 = vmatpush.bf16.msrb.mxu2 %v2757_v6 }
  0x46   :  { %718 = vmatpush.bf16.msrb.mxu3 %v2765_v7 }
  0x47   :  { %680 = vmatpush.bf16.msrb.mxu0 %v2740_v8 }
  0x48   :  { %693 = vmatpush.bf16.msrb.mxu1 %v2748_v9 }
  0x49   :  { %706 = vmatpush.bf16.msrb.mxu2 %v2756_v10 }
  0x4a   :  { %719 = vmatpush.bf16.msrb.mxu3 %v2764_v11  ;;  %v747_v11 = vld [vmem:[%s3123_s3] sm:$0x1] }
  0x4b   :  { %681 = vmatpush.bf16.msrb.mxu0 %v2739_v12 }
  0x4c   :  { %694 = vmatpush.bf16.msrb.mxu1 %v2747_v13 }
  0x4d   :  { %707 = vmatpush.bf16.msrb.mxu2 %v2755_v14 }
  0x4e   :  { %720 = vmatpush.bf16.msrb.mxu3 %v2763_v17  ;;  %682 = vmatmul.bf16.vlgmr.msrb.gmra.mxu0 %v102_v20 }
  0x4f   :  { %695 = vmatmul.bf16.vlgmr.msrb.gmra.mxu1 %v103_v21 }
  0x50   :  { %708 = vmatmul.bf16.vlgmr.msrb.gmra.mxu2 %v104_v22 }
  0x51   :  { %721 = vmatmul.bf16.vlgmr.msrb.gmra.mxu3 %v105_v23 }
  0xab   :  { %v631_v24 = vpop.f32.mrf.mxu0 }
  0xac   :  { %v644_v25 = vpop.f32.mrf.mxu1  ;;  %v632_v33 = vadd.f32 %v2887_v30, %v631_v24 }
  0xae   :  { %v645_v34 = vadd.f32 %v644_v25, %v632_v33 }
  0xb3   :  { %v657_v26 = vpop.f32.mrf.mxu2  ;;  %v633_v28 = vpop.f32.mrf.mxu0 }
  0xb4   :  { %v670_v27 = vpop.f32.mrf.mxu3  ;;  %v646_v29 = vpop.f32.mrf.mxu1  ;;  %v658_v35 = vadd.f32 %v657_v26, %v645_v34 }
  0xb6   :  { %v671_v36 = vadd.f32 %v670_v27, %v658_v35 }
  0xbb   :  { %v659_v31 = vpop.f32.mrf.mxu2 }
  0xbc   :  { %v672_v32 = vpop.f32.mrf.mxu3 }
  0xcb   :  { %v683_v37 = vpop.f32.mrf.mxu0 }
  0xcc   :  { %v696_v38 = vpop.f32.mrf.mxu1  ;;  %v684_v40 = vadd.f32 %v683_v37, %v671_v36 }
  0xce   :  { %v697_v42 = vadd.f32 %v696_v38, %v684_v40 }
  0xd3   :  { %v709_v43 = vpop.f32.mrf.mxu2  ;;  %v685_v46 = vpop.f32.mrf.mxu0 }
  0xd4   :  { %v722_v44 = vpop.f32.mrf.mxu3  ;;  %v710_v45 = vadd.f32 %v709_v43, %v697_v42  ;;  %v698_v47 = vpop.f32.mrf.mxu1 }
  0xd6   :  { %v723_v48 = vadd.f32 %v722_v44, %v710_v45 }
  0xd8   :  { %v729_v49 = vsel %vm728_vm0, %v723_v48, 0.0 }
  0xd9   :  { %v730_v50 = vrot.slane %v729_v49, 4  ;;  %v737_v51 = vmul.f32 %v729_v49, %v729_v49 }
  0xdb   :  { %v731_v52 = vadd.f32 %v730_v50, %v729_v49  ;;  %v738_v53 = vrot.slane %v737_v51, 4  ;;  %v711_v54 = vpop.f32.mrf.mxu2 }
  0xdc   :  { %v724_v55 = vpop.f32.mrf.mxu3 }
  0xdd   :  { %v732_v56 = vrot.slane %v731_v52, 2  ;;  %v739_v57 = vadd.f32 %v738_v53, %v737_v51 }
  0xdf   :  { %v733_v58 = vadd.f32 %v732_v56, %v731_v52  ;;  %v740_v59 = vrot.slane %v739_v57, 2 }
  0xe1   :  { %v734_v60 = vrot.slane %v733_v58, 1  ;;  %v741_v61 = vadd.f32 %v740_v59, %v739_v57 }
  0xe3   :  { %v735_v62 = vadd.f32 %v734_v60, %v733_v58  ;;  %v742_v63 = vrot.slane %v741_v61, 1 }
  0xe5   :  { %v736_v0 = vmul.f32 0.5, %v735_v62  ;;  %v743_v1 = vadd.f32 %v742_v63, %v741_v61 }
  0xe7   :  { %v744_v2 = vmul.f32 0.5, %v743_v1  ;;  %v745_v3 = vmul.f32 %v736_v0, %v736_v0 }
  0xe9   :  { %v746_v4 = vsub.f32 %v744_v2, %v745_v3 }
  0xeb   :  { %v748_v5 = vadd.f32 1e-05, %v746_v4 }
  0xed   :  { %2888 = vrsqrt.f32 %v748_v5  ;;  %vm755_vm2 = vweird.f32 %v748_v5 }
  0xf3   :  { %v2889_v6 = vpop.eup %2888 }
  0xf4   :  { %v750_v7 = vmul.f32 %v2889_v6, %v748_v5  ;;  %vm756_vm1 = vweird.f32 %v2889_v6 }
  0xf5   :  { %vm757_vm3 = vmor %vm755_vm2, %vm756_vm1 }
  0xf6   :  { %v751_v8 = vmul.f32 %v2889_v6, %v750_v7 }
  0xf8   :  { %v752_v9 = vmul.f32 0.5, %v751_v8 }
  0xfa   :  { %v753_v10 = vsub.f32 1.5, %v752_v9 }
  0xfc   :  { %v754_v12 = vmul.f32 %v2889_v6, %v753_v10 }
  0xfe   :  { %v758_v13 = vsel %vm757_vm3, %v2889_v6, %v754_v12 }
  0xff   :  { %v759_v14 = vmul.f32 %v758_v13, %v747_v11 }
 0x101   :  { %v761_v16 = vmul.f32 %v759_v14, %v736_v0  ;;  %v764_v17 = vperm.slane %v759_v14, 0 }
 0x103   :  { %v762_v18 = vsub.f32 %v760_v15, %v761_v16  ;;  %v766_v19 = vmul.f32 %v764_v17, %v723_v48 }
 0x105   :  { %v768_v20 = vperm.slane %v762_v18, 0 }
 0x107   :  { %v770_v21 = vadd.f32 %v768_v20, %v766_v19 }
 0x109   :  { %v771_v22 = vmax.f32 %v770_v21, 0.0 }
 0x10a   :  { %2954 = dma.done.wait [#allocation4], 13312 }
 0x10b   :  { %2955 = vsyncadd [#allocation4], 4294953984 }
 0x10c   :  { %2956 = dma.done.wait [#allocation4 + $0x1], 1024 }
 0x10d   :  { %2957 = vsyncadd [#allocation4 + $0x1], 4294966272  ;;  %v2778_v23 = vld [vmem:[#allocation2 + $0x38] sm:$0xff]  ;;  %v2777_v24 = vld [vmem:[#allocation2 + $0x30] sm:$0xff]  ;;  %v781_v37 = vpack.c.bf16 %v771_v22, %v771_v22 }
 0x10e   :  { %850 = vmatpush.bf16.msra.mxu0 %v2778_v23  ;;  %v2786_v25 = vld [vmem:[#allocation2 + $0x78] sm:$0xff]  ;;  %v2785_v26 = vld [vmem:[#allocation2 + $0x70] sm:$0xff]  ;;  %v2776_v27 = vld [vmem:[#allocation2 + $0x28] sm:$0xff] }
 0x10f   :  { %935 = vmatpush.bf16.msra.mxu1 %v2786_v25  ;;  %v2784_v28 = vld [vmem:[#allocation2 + $0x68] sm:$0xff]  ;;  %v2775_v29 = vld [vmem:[#allocation2 + $0x20] sm:$0xff]  ;;  %v2774_v31 = vld [vmem:[#allocation2 + $0x18] sm:$0xff] }
 0x110   :  { %v2783_v30 = vld [vmem:[#allocation2 + $0x60] sm:$0xff]  ;;  %v2782_v32 = vld [vmem:[#allocation2 + $0x58] sm:$0xff]  ;;  %v2773_v33 = vld [vmem:[#allocation2 + $0x10] sm:$0xff] }
 0x111   :  { %v2781_v34 = vld [vmem:[#allocation2 + $0x50] sm:$0xff]  ;;  %v2772_v35 = vld [vmem:[#allocation2 + $0x8] sm:$0xff]  ;;  %v2771_v36 = vld [vmem:[#allocation2] sm:$0xff] }
 0x112   :  { %851 = vmatpush.bf16.msra.mxu0 %v2777_v24  ;;  %v2780_v38 = vld [vmem:[#allocation2 + $0x48] sm:$0xff]  ;;  %v2779_v39 = vld [vmem:[#allocation2 + $0x40] sm:$0xff]  ;;  %v2794_v40 = vld [vmem:[#allocation2 + $0xb8] sm:$0xff] }
 0x113   :  { %936 = vmatpush.bf16.msra.mxu1 %v2785_v26  ;;  %1020 = vmatpush.bf16.msra.mxu2 %v2794_v40  ;;  %v2793_v41 = vld [vmem:[#allocation2 + $0xb0] sm:$0xff]  ;;  %v2792_v42 = vld [vmem:[#allocation2 + $0xa8] sm:$0xff]  ;;  %v2791_v43 = vld [vmem:[#allocation2 + $0xa0] sm:$0xff] }
 0x114   :  { %v2790_v44 = vld [vmem:[#allocation2 + $0x98] sm:$0xff]  ;;  %v2789_v45 = vld [vmem:[#allocation2 + $0x90] sm:$0xff]  ;;  %v2890_v46 = vld [vmem:[%s3126_s6] ss:$0 sm:$0xff] }
 0x115   :  { %v2788_v52 = vld [vmem:[#allocation2 + $0x88] sm:$0xff]  ;;  %v2787_v53 = vld [vmem:[#allocation2 + $0x80] sm:$0xff]  ;;  %v2802_v54 = vld [vmem:[#allocation2 + $0xf8] sm:$0xff] }
 0x116   :  { %852 = vmatpush.bf16.msra.mxu0 %v2776_v27  ;;  %1105 = vmatpush.bf16.msra.mxu3 %v2802_v54  ;;  %v2801_v55 = vld [vmem:[#allocation2 + $0xf0] sm:$0xff]  ;;  %v2800_v56 = vld [vmem:[#allocation2 + $0xe8] sm:$0xff]  ;;  %v2799_v57 = vld [vmem:[#allocation2 + $0xe0] sm:$0xff] }
 0x117   :  { %937 = vmatpush.bf16.msra.mxu1 %v2784_v28  ;;  %1021 = vmatpush.bf16.msra.mxu2 %v2793_v41  ;;  %v2798_v58 = vld [vmem:[#allocation2 + $0xd8] sm:$0xff]  ;;  %v2797_v59 = vld [vmem:[#allocation2 + $0xd0] sm:$0xff]  ;;  %v2891_v60 = vld [vmem:[%s3126_s6 + $0x1] ss:$0 sm:$0xff] }
 0x118   :  { %v2796_v2 = vld [vmem:[#allocation2 + $0xc8] sm:$0xff]  ;;  %v2795_v3 = vld [vmem:[#allocation2 + $0xc0] sm:$0xff]  ;;  %v2810_v4 = vld [vmem:[#allocation2 + $0x138] sm:$0xff] }
 0x119   :  { %v2809_v5 = vld [vmem:[#allocation2 + $0x130] sm:$0xff]  ;;  %v2808_v6 = vld [vmem:[#allocation2 + $0x128] sm:$0xff]  ;;  %v2807_v7 = vld [vmem:[#allocation2 + $0x120] sm:$0xff] }
 0x11a   :  { %853 = vmatpush.bf16.msra.mxu0 %v2775_v29  ;;  %1106 = vmatpush.bf16.msra.mxu3 %v2801_v55  ;;  %v2806_v8 = vld [vmem:[#allocation2 + $0x118] sm:$0xff]  ;;  %v2805_v9 = vld [vmem:[#allocation2 + $0x110] sm:$0xff]  ;;  %v2892_v10 = vld [vmem:[%s3126_s6 + $0x2] ss:$0 sm:$0xff] }
 0x11b   :  { %938 = vmatpush.bf16.msra.mxu1 %v2783_v30  ;;  %1022 = vmatpush.bf16.msra.mxu2 %v2792_v42  ;;  %v2804_v16 = vld [vmem:[#allocation2 + $0x108] sm:$0xff]  ;;  %v2803_v17 = vld [vmem:[#allocation2 + $0x100] sm:$0xff]  ;;  %v2818_v18 = vld [vmem:[#allocation2 + $0x178] sm:$0xff] }
 0x11c   :  { %v2817_v19 = vld [vmem:[#allocation2 + $0x170] sm:$0xff]  ;;  %v2816_v20 = vld [vmem:[#allocation2 + $0x168] sm:$0xff]  ;;  %v2815_v21 = vld [vmem:[#allocation2 + $0x160] sm:$0xff] }
 0x11d   :  { %v2814_v22 = vld [vmem:[#allocation2 + $0x158] sm:$0xff]  ;;  %v2813_v23 = vld [vmem:[#allocation2 + $0x150] sm:$0xff]  ;;  %v2893_v24 = vld [vmem:[%s3126_s6 + $0x3] ss:$0 sm:$0xff] }
 0x11e   :  { %854 = vmatpush.bf16.msra.mxu0 %v2774_v31  ;;  %1107 = vmatpush.bf16.msra.mxu3 %v2800_v56  ;;  %v2812_v30 = vld [vmem:[#allocation2 + $0x148] sm:$0xff]  ;;  %v2811_v31 = vld [vmem:[#allocation2 + $0x140] sm:$0xff] }
 0x11f   :  { %939 = vmatpush.bf16.msra.mxu1 %v2782_v32  ;;  %1023 = vmatpush.bf16.msra.mxu2 %v2791_v43  ;;  %v2826_v32 = vld [vmem:[#allocation2 + $0x1b8] sm:$0xff] }
 0x122   :  { %855 = vmatpush.bf16.msra.mxu0 %v2773_v33  ;;  %1108 = vmatpush.bf16.msra.mxu3 %v2799_v57  ;;  %v2825_v33 = vld [vmem:[#allocation2 + $0x1b0] sm:$0xff] }
 0x123   :  { %940 = vmatpush.bf16.msra.mxu1 %v2781_v34  ;;  %1024 = vmatpush.bf16.msra.mxu2 %v2790_v44  ;;  %v2824_v34 = vld [vmem:[#allocation2 + $0x1a8] sm:$0xff] }
 0x124   :  { %v2820_v44 = vld [vmem:[#allocation2 + $0x188] sm:$0xff] }
 0x126   :  { %856 = vmatpush.bf16.msra.mxu0 %v2772_v35  ;;  %1109 = vmatpush.bf16.msra.mxu3 %v2798_v58  ;;  %v2823_v35 = vld [vmem:[#allocation2 + $0x1a0] sm:$0xff]  ;;  %v2828_v58 = vld [vmem:[#allocation2 + $0x1c8] sm:$0xff] }
 0x127   :  { %941 = vmatpush.bf16.msra.mxu1 %v2780_v38  ;;  %1025 = vmatpush.bf16.msra.mxu2 %v2789_v45  ;;  %v2894_v38 = vld [vmem:[%s3126_s6 + $0x4] ss:$0 sm:$0xff] }
 0x128   :  { %v2819_v45 = vld [vmem:[#allocation2 + $0x180] sm:$0xff] }
 0x12a   :  { %857 = vmatpush.bf16.msra.mxu0 %v2771_v36  ;;  %1110 = vmatpush.bf16.msra.mxu3 %v2797_v59  ;;  %v2822_v36 = vld [vmem:[#allocation2 + $0x198] sm:$0xff]  ;;  %v2827_v59 = vld [vmem:[#allocation2 + $0x1c0] sm:$0xff] }
 0x12b   :  { %942 = vmatpush.bf16.msra.mxu1 %v2779_v39  ;;  %1026 = vmatpush.bf16.msra.mxu2 %v2788_v52  ;;  %v2895_v52 = vld [vmem:[%s3126_s6 + $0x5] ss:$0 sm:$0xff] }
 0x12d   :  { %858 = vmatmul.bf16.vlgmr.msra.gmra.mxu0 %v781_v37  ;;  %v2821_v37 = vld [vmem:[#allocation2 + $0x190] sm:$0xff] }
 0x12e   :  { %1111 = vmatpush.bf16.msra.mxu3 %v2796_v2  ;;  %1190 = vmatpush.bf16.msrb.mxu0 %v2810_v4  ;;  %v2896_v2 = vld [vmem:[%s3126_s6 + $0x6] ss:$0 sm:$0xff] }
 0x12f   :  { %1027 = vmatpush.bf16.msra.mxu2 %v2787_v53  ;;  %1275 = vmatpush.bf16.msrb.mxu1 %v2818_v18 }
 0x132   :  { %1112 = vmatpush.bf16.msra.mxu3 %v2795_v3  ;;  %1191 = vmatpush.bf16.msrb.mxu0 %v2809_v5 }
 0x133   :  { %1276 = vmatpush.bf16.msrb.mxu1 %v2817_v19  ;;  %1360 = vmatpush.bf16.msrb.mxu2 %v2826_v32 }
 0x136   :  { %1192 = vmatpush.bf16.msrb.mxu0 %v2808_v6 }
 0x137   :  { %1277 = vmatpush.bf16.msrb.mxu1 %v2816_v20  ;;  %1361 = vmatpush.bf16.msrb.mxu2 %v2825_v33 }
 0x13a   :  { %1193 = vmatpush.bf16.msrb.mxu0 %v2807_v7 }
 0x13b   :  { %1278 = vmatpush.bf16.msrb.mxu1 %v2815_v21  ;;  %1362 = vmatpush.bf16.msrb.mxu2 %v2824_v34 }
 0x13e   :  { %1194 = vmatpush.bf16.msrb.mxu0 %v2806_v8  ;;  %v2836_v8 = vld [vmem:[#allocation2 + $0x208] sm:$0xff] }
 0x13f   :  { %1279 = vmatpush.bf16.msrb.mxu1 %v2814_v22  ;;  %1363 = vmatpush.bf16.msrb.mxu2 %v2823_v35  ;;  %v2844_v22 = vld [vmem:[#allocation2 + $0x248] sm:$0xff] }
 0x142   :  { %1195 = vmatpush.bf16.msrb.mxu0 %v2805_v9  ;;  %v2835_v9 = vld [vmem:[#allocation2 + $0x200] sm:$0xff] }
 0x143   :  { %1280 = vmatpush.bf16.msrb.mxu1 %v2813_v23  ;;  %1364 = vmatpush.bf16.msrb.mxu2 %v2822_v36  ;;  %v2843_v23 = vld [vmem:[#allocation2 + $0x240] sm:$0xff]  ;;  %v2852_v36 = vld [vmem:[#allocation2 + $0x288] sm:$0xff] }
 0x146   :  { %1196 = vmatpush.bf16.msrb.mxu0 %v2804_v16  ;;  %v2897_v16 = vld [vmem:[%s3126_s6 + $0x7] ss:$0 sm:$0xff] }
 0x147   :  { %1281 = vmatpush.bf16.msrb.mxu1 %v2812_v30  ;;  %1365 = vmatpush.bf16.msrb.mxu2 %v2821_v37  ;;  %v2898_v30 = vld [vmem:[%s3126_s6 + $0x8] ss:$0 sm:$0xff]  ;;  %v2851_v37 = vld [vmem:[#allocation2 + $0x280] sm:$0xff] }
 0x14a   :  { %1197 = vmatpush.bf16.msrb.mxu0 %v2803_v17 }
 0x14b   :  { %1282 = vmatpush.bf16.msrb.mxu1 %v2811_v31  ;;  %1366 = vmatpush.bf16.msrb.mxu2 %v2820_v44  ;;  %v2899_v44 = vld [vmem:[%s3126_s6 + $0x9] ss:$0 sm:$0xff] }
 0x14f   :  { %1367 = vmatpush.bf16.msrb.mxu2 %v2819_v45 }
 0x1aa   :  { %v859_v47 = vpop.f32.mrf.mxu0 }
 0x1ab   :  { %v860_v48 = vadd.f32 %v2890_v46, %v859_v47  ;;  %v2834_v46 = vld [vmem:[#allocation2 + $0x1f8] sm:$0xff]  ;;  %v2833_v47 = vld [vmem:[#allocation2 + $0x1f0] sm:$0xff] }
 0x1ac   :  { %1445 = vmatpush.bf16.msrb.mxu3 %v2834_v46 }
 0x1ad   :  { %v863_v49 = vmax.f32 %v860_v48, 0.0  ;;  %v2832_v48 = vld [vmem:[#allocation2 + $0x1e8] sm:$0xff] }
 0x1af   :  { %v864_v50 = vpack.c.bf16 %v863_v49, %v863_v49  ;;  %v2831_v49 = vld [vmem:[#allocation2 + $0x1e0] sm:$0xff] }
 0x1b0   :  { %1446 = vmatpush.bf16.msrb.mxu3 %v2833_v47 }
 0x1b1   :  { %943 = vmatmul.bf16.vlgmr.msra.gmra.mxu1 %v864_v50  ;;  %v2830_v50 = vld [vmem:[#allocation2 + $0x1d8] sm:$0xff] }
 0x1b2   :  { %v861_v51 = vpop.f32.mrf.mxu0 }
 0x1b3   :  { %v2829_v51 = vld [vmem:[#allocation2 + $0x1d0] sm:$0xff] }
 0x1b4   :  { %1447 = vmatpush.bf16.msrb.mxu3 %v2832_v48 }
 0x1b8   :  { %1448 = vmatpush.bf16.msrb.mxu3 %v2831_v49 }
 0x1bc   :  { %1449 = vmatpush.bf16.msrb.mxu3 %v2830_v50  ;;  %v2860_v50 = vld [vmem:[#allocation2 + $0x2c8] sm:$0xff] }
 0x1c0   :  { %1450 = vmatpush.bf16.msrb.mxu3 %v2829_v51  ;;  %v2859_v51 = vld [vmem:[#allocation2 + $0x2c0] sm:$0xff] }
 0x1c4   :  { %1451 = vmatpush.bf16.msrb.mxu3 %v2828_v58  ;;  %v2900_v58 = vld [vmem:[%s3126_s6 + $0xa] ss:$0 sm:$0xff] }
 0x1c8   :  { %1452 = vmatpush.bf16.msrb.mxu3 %v2827_v59 }
 0x22e   :  { %v944_v61 = vpop.f32.mrf.mxu1 }
 0x22f   :  { %v945_v62 = vadd.f32 %v2891_v60, %v944_v61  ;;  %v2842_v60 = vld [vmem:[#allocation2 + $0x238] sm:$0xff]  ;;  %v2841_v61 = vld [vmem:[#allocation2 + $0x230] sm:$0xff] }
 0x230   :  { %1530 = vmatpush.bf16.msra.mxu0 %v2842_v60 }
 0x231   :  { %v948_v63 = vmax.f32 %v945_v62, 0.0  ;;  %v2840_v62 = vld [vmem:[#allocation2 + $0x228] sm:$0xff] }
 0x233   :  { %v949_v0 = vpack.c.bf16 %v948_v63, %v948_v63  ;;  %v2839_v63 = vld [vmem:[#allocation2 + $0x220] sm:$0xff] }
 0x234   :  { %1531 = vmatpush.bf16.msra.mxu0 %v2841_v61 }
 0x235   :  { %1028 = vmatmul.bf16.vlgmr.msra.gmra.mxu2 %v949_v0  ;;  %v2838_v0 = vld [vmem:[#allocation2 + $0x218] sm:$0xff] }
 0x236   :  { %v946_v1 = vpop.f32.mrf.mxu1 }
 0x237   :  { %v2837_v1 = vld [vmem:[#allocation2 + $0x210] sm:$0xff] }
 0x238   :  { %1532 = vmatpush.bf16.msra.mxu0 %v2840_v62 }
 0x23c   :  { %1533 = vmatpush.bf16.msra.mxu0 %v2839_v63 }
 0x240   :  { %1534 = vmatpush.bf16.msra.mxu0 %v2838_v0  ;;  %v2868_v0 = vld [vmem:[#allocation2 + $0x308] sm:$0xff] }
 0x244   :  { %1535 = vmatpush.bf16.msra.mxu0 %v2837_v1  ;;  %v2867_v1 = vld [vmem:[#allocation2 + $0x300] sm:$0xff] }
 0x248   :  { %1536 = vmatpush.bf16.msra.mxu0 %v2836_v8  ;;  %v2901_v8 = vld [vmem:[%s3126_s6 + $0xb] ss:$0 sm:$0xff] }
 0x24c   :  { %1537 = vmatpush.bf16.msra.mxu0 %v2835_v9 }
 0x2b8   :  { %v1029_v11 = vpop.f32.mrf.mxu2 }
 0x2b9   :  { %v1030_v12 = vadd.f32 %v2892_v10, %v1029_v11  ;;  %v2850_v10 = vld [vmem:[#allocation2 + $0x278] sm:$0xff]  ;;  %v2849_v11 = vld [vmem:[#allocation2 + $0x270] sm:$0xff] }
 0x2ba   :  { %1615 = vmatpush.bf16.msra.mxu1 %v2850_v10 }
 0x2bb   :  { %v1033_v13 = vmax.f32 %v1030_v12, 0.0  ;;  %v2848_v12 = vld [vmem:[#allocation2 + $0x268] sm:$0xff] }
 0x2bd   :  { %v1034_v14 = vpack.c.bf16 %v1033_v13, %v1033_v13  ;;  %v2847_v13 = vld [vmem:[#allocation2 + $0x260] sm:$0xff] }
 0x2be   :  { %1616 = vmatpush.bf16.msra.mxu1 %v2849_v11 }
 0x2bf   :  { %1113 = vmatmul.bf16.vlgmr.msra.gmra.mxu3 %v1034_v14  ;;  %v2846_v14 = vld [vmem:[#allocation2 + $0x258] sm:$0xff] }
 0x2c0   :  { %v1031_v15 = vpop.f32.mrf.mxu2 }
 0x2c1   :  { %v2845_v15 = vld [vmem:[#allocation2 + $0x250] sm:$0xff] }
 0x2c2   :  { %1617 = vmatpush.bf16.msra.mxu1 %v2848_v12 }
 0x2c6   :  { %1618 = vmatpush.bf16.msra.mxu1 %v2847_v13 }
 0x2ca   :  { %1619 = vmatpush.bf16.msra.mxu1 %v2846_v14  ;;  %v2876_v14 = vld [vmem:[#allocation3] sm:$0xff] }
 0x2ce   :  { %1620 = vmatpush.bf16.msra.mxu1 %v2845_v15  ;;  %v2875_v15 = vld [vmem:[#allocation3 + $0x30] sm:$0xff] }
 0x2d2   :  { %1621 = vmatpush.bf16.msra.mxu1 %v2844_v22  ;;  %v2903_v22 = vld [vmem:[%s3128_s8] ss:$0 sm:$0xff] }
 0x2d6   :  { %1622 = vmatpush.bf16.msra.mxu1 %v2843_v23 }
 0x342   :  { %v1114_v25 = vpop.f32.mrf.mxu3 }
 0x343   :  { %v1115_v26 = vadd.f32 %v2893_v24, %v1114_v25  ;;  %v2858_v24 = vld [vmem:[#allocation2 + $0x2b8] sm:$0xff]  ;;  %v2857_v25 = vld [vmem:[#allocation2 + $0x2b0] sm:$0xff] }
 0x344   :  { %1700 = vmatpush.bf16.msra.mxu2 %v2858_v24 }
 0x345   :  { %v1118_v27 = vmax.f32 %v1115_v26, 0.0  ;;  %v2856_v26 = vld [vmem:[#allocation2 + $0x2a8] sm:$0xff] }
 0x347   :  { %v1119_v28 = vpack.c.bf16 %v1118_v27, %v1118_v27  ;;  %v2855_v27 = vld [vmem:[#allocation2 + $0x2a0] sm:$0xff] }
 0x348   :  { %1701 = vmatpush.bf16.msra.mxu2 %v2857_v25 }
 0x349   :  { %1198 = vmatmul.bf16.vlgmr.msrb.gmra.mxu0 %v1119_v28  ;;  %v2854_v28 = vld [vmem:[#allocation2 + $0x298] sm:$0xff] }
 0x34a   :  { %v1116_v29 = vpop.f32.mrf.mxu3 }
 0x34b   :  { %v2853_v29 = vld [vmem:[#allocation2 + $0x290] sm:$0xff] }
 0x34c   :  { %1702 = vmatpush.bf16.msra.mxu2 %v2856_v26 }
 0x350   :  { %1703 = vmatpush.bf16.msra.mxu2 %v2855_v27 }
 0x354   :  { %1704 = vmatpush.bf16.msra.mxu2 %v2854_v28 }
 0x358   :  { %1705 = vmatpush.bf16.msra.mxu2 %v2853_v29 }
 0x35c   :  { %1706 = vmatpush.bf16.msra.mxu2 %v2852_v36 }
 0x360   :  { %1707 = vmatpush.bf16.msra.mxu2 %v2851_v37 }
 0x3c6   :  { %v1199_v39 = vpop.f32.mrf.mxu0 }
 0x3c7   :  { %v1200_v40 = vadd.f32 %v2894_v38, %v1199_v39  ;;  %v2866_v38 = vld [vmem:[#allocation2 + $0x2f8] sm:$0xff]  ;;  %v2865_v39 = vld [vmem:[#allocation2 + $0x2f0] sm:$0xff] }
 0x3c8   :  { %1785 = vmatpush.bf16.msra.mxu3 %v2866_v38 }
 0x3c9   :  { %v1203_v41 = vmax.f32 %v1200_v40, 0.0  ;;  %v2864_v40 = vld [vmem:[#allocation2 + $0x2e8] sm:$0xff] }
 0x3cb   :  { %v1204_v42 = vpack.c.bf16 %v1203_v41, %v1203_v41  ;;  %v2863_v41 = vld [vmem:[#allocation2 + $0x2e0] sm:$0xff] }
 0x3cc   :  { %1786 = vmatpush.bf16.msra.mxu3 %v2865_v39 }
 0x3cd   :  { %1283 = vmatmul.bf16.vlgmr.msrb.gmra.mxu1 %v1204_v42  ;;  %v2862_v42 = vld [vmem:[#allocation2 + $0x2d8] sm:$0xff] }
 0x3ce   :  { %v1201_v43 = vpop.f32.mrf.mxu0 }
 0x3cf   :  { %v2861_v43 = vld [vmem:[#allocation2 + $0x2d0] sm:$0xff] }
 0x3d0   :  { %1787 = vmatpush.bf16.msra.mxu3 %v2864_v40 }
 0x3d4   :  { %1788 = vmatpush.bf16.msra.mxu3 %v2863_v41 }
 0x3d8   :  { %1789 = vmatpush.bf16.msra.mxu3 %v2862_v42 }
 0x3dc   :  { %1790 = vmatpush.bf16.msra.mxu3 %v2861_v43 }
 0x3e0   :  { %1791 = vmatpush.bf16.msra.mxu3 %v2860_v50 }
 0x3e4   :  { %1792 = vmatpush.bf16.msra.mxu3 %v2859_v51 }
 0x44a   :  { %v1284_v53 = vpop.f32.mrf.mxu1 }
 0x44b   :  { %v1285_v54 = vadd.f32 %v2895_v52, %v1284_v53  ;;  %v2874_v52 = vld [vmem:[#allocation2 + $0x338] sm:$0xff]  ;;  %v2873_v53 = vld [vmem:[#allocation2 + $0x330] sm:$0xff] }
 0x44c   :  { %1870 = vmatpush.bf16.msrb.mxu0 %v2874_v52 }
 0x44d   :  { %v1288_v55 = vmax.f32 %v1285_v54, 0.0  ;;  %v2872_v54 = vld [vmem:[#allocation2 + $0x328] sm:$0xff] }
 0x44f   :  { %v1289_v56 = vpack.c.bf16 %v1288_v55, %v1288_v55  ;;  %v2871_v55 = vld [vmem:[#allocation2 + $0x320] sm:$0xff] }
 0x450   :  { %1871 = vmatpush.bf16.msrb.mxu0 %v2873_v53 }
 0x451   :  { %1368 = vmatmul.bf16.vlgmr.msrb.gmra.mxu2 %v1289_v56  ;;  %v2870_v56 = vld [vmem:[#allocation2 + $0x318] sm:$0xff] }
 0x452   :  { %v1286_v57 = vpop.f32.mrf.mxu1 }
 0x453   :  { %v2869_v57 = vld [vmem:[#allocation2 + $0x310] sm:$0xff] }
 0x454   :  { %1872 = vmatpush.bf16.msrb.mxu0 %v2872_v54 }
 0x458   :  { %1873 = vmatpush.bf16.msrb.mxu0 %v2871_v55 }
 0x45c   :  { %1874 = vmatpush.bf16.msrb.mxu0 %v2870_v56 }
 0x460   :  { %1875 = vmatpush.bf16.msrb.mxu0 %v2869_v57 }
 0x464   :  { %1876 = vmatpush.bf16.msrb.mxu0 %v2868_v0 }
 0x468   :  { %1877 = vmatpush.bf16.msrb.mxu0 %v2867_v1 }
 0x4d4   :  { %v1369_v3 = vpop.f32.mrf.mxu2 }
 0x4d5   :  { %v1370_v4 = vadd.f32 %v2896_v2, %v1369_v3  ;;  %v2882_v2 = vld [vmem:[#allocation3 + $0x38] sm:$0xff]  ;;  %v2881_v3 = vld [vmem:[#allocation3 + $0x28] sm:$0xff] }
 0x4d6   :  { %1953 = vmatpush.bf16.msrb.mxu1 %v2882_v2 }
 0x4d7   :  { %v1373_v5 = vmax.f32 %v1370_v4, 0.0  ;;  %v2880_v4 = vld [vmem:[#allocation3 + $0x20] sm:$0xff] }
 0x4d9   :  { %v1374_v6 = vpack.c.bf16 %v1373_v5, %v1373_v5  ;;  %v2879_v5 = vld [vmem:[#allocation3 + $0x8] sm:$0xff] }
 0x4da   :  { %1954 = vmatpush.bf16.msrb.mxu1 %v2881_v3 }
 0x4db   :  { %1453 = vmatmul.bf16.vlgmr.msrb.gmra.mxu3 %v1374_v6  ;;  %v2878_v6 = vld [vmem:[#allocation3 + $0x10] sm:$0xff] }
 0x4dc   :  { %v1371_v7 = vpop.f32.mrf.mxu2 }
 0x4dd   :  { %v2877_v7 = vld [vmem:[#allocation3 + $0x18] sm:$0xff] }
 0x4de   :  { %1955 = vmatpush.bf16.msrb.mxu1 %v2880_v4 }
 0x4e2   :  { %1956 = vmatpush.bf16.msrb.mxu1 %v2879_v5 }
 0x4e6   :  { %1957 = vmatpush.bf16.msrb.mxu1 %v2878_v6 }
 0x4ea   :  { %1958 = vmatpush.bf16.msrb.mxu1 %v2877_v7 }
 0x4ee   :  { %1959 = vmatpush.bf16.msrb.mxu1 %v2876_v14 }
 0x4f2   :  { %1960 = vmatpush.bf16.msrb.mxu1 %v2875_v15 }
 0x55e   :  { %v1454_v17 = vpop.f32.mrf.mxu3 }
 0x55f   :  { %v1455_v18 = vadd.f32 %v2897_v16, %v1454_v17  ;;  %v2902_v16 = vld [vmem:[%s3126_s6 + $0xc] ss:$0 sm:$0xff] }
 0x561   :  { %v1458_v19 = vmax.f32 %v1455_v18, 0.0 }
 0x563   :  { %v1459_v20 = vpack.c.bf16 %v1458_v19, %v1458_v19 }
 0x565   :  { %1538 = vmatmul.bf16.vlgmr.msra.gmra.mxu0 %v1459_v20 }
 0x566   :  { %v1456_v21 = vpop.f32.mrf.mxu3 }
 0x5e2   :  { %v1539_v31 = vpop.f32.mrf.mxu0 }
 0x5e3   :  { %v1540_v32 = vadd.f32 %v2898_v30, %v1539_v31 }
 0x5e5   :  { %v1543_v33 = vmax.f32 %v1540_v32, 0.0 }
 0x5e7   :  { %v1544_v34 = vpack.c.bf16 %v1543_v33, %v1543_v33 }
 0x5e9   :  { %1623 = vmatmul.bf16.vlgmr.msra.gmra.mxu1 %v1544_v34 }
 0x5ea   :  { %v1541_v35 = vpop.f32.mrf.mxu0 }
 0x666   :  { %v1624_v45 = vpop.f32.mrf.mxu1 }
 0x667   :  { %v1625_v46 = vadd.f32 %v2899_v44, %v1624_v45 }
 0x669   :  { %v1628_v47 = vmax.f32 %v1625_v46, 0.0 }
 0x66b   :  { %v1629_v48 = vpack.c.bf16 %v1628_v47, %v1628_v47 }
 0x66d   :  { %1708 = vmatmul.bf16.vlgmr.msra.gmra.mxu2 %v1629_v48 }
 0x66e   :  { %v1626_v49 = vpop.f32.mrf.mxu1 }
 0x6f0   :  { %v1709_v59 = vpop.f32.mrf.mxu2 }
 0x6f1   :  { %v1710_v60 = vadd.f32 %v2900_v58, %v1709_v59 }
 0x6f3   :  { %v1713_v61 = vmax.f32 %v1710_v60, 0.0 }
 0x6f5   :  { %v1714_v62 = vpack.c.bf16 %v1713_v61, %v1713_v61 }
 0x6f7   :  { %1793 = vmatmul.bf16.vlgmr.msra.gmra.mxu3 %v1714_v62 }
 0x6f8   :  { %v1711_v63 = vpop.f32.mrf.mxu2 }
 0x77a   :  { %v1794_v9 = vpop.f32.mrf.mxu3 }
 0x77b   :  { %v1795_v10 = vadd.f32 %v2901_v8, %v1794_v9 }
 0x77d   :  { %v1798_v11 = vmax.f32 %v1795_v10, 0.0 }
 0x77f   :  { %v1799_v12 = vpack.c.bf16 %v1798_v11, %v1798_v11 }
 0x781   :  { %1878 = vmatmul.bf16.vlgmr.msrb.gmra.mxu0 %v1799_v12 }
 0x782   :  { %v1796_v13 = vpop.f32.mrf.mxu3 }
 0x7fe   :  { %v1879_v17 = vpop.f32.mrf.mxu0 }
 0x7ff   :  { %v1880_v18 = vadd.f32 %v2902_v16, %v1879_v17 }
 0x801   :  { %v1883_v19 = vmax.f32 %v1880_v18, 0.0 }
 0x803   :  { %v1884_v20 = vpack.c.bf16 %v1883_v19, %v1883_v19 }
 0x805   :  { %1961 = vmatmul.bf16.vlgmr.msrb.gmra.mxu1 %v1884_v20 }
 0x806   :  { %v1881_v21 = vpop.f32.mrf.mxu0 }
 0x882   :  { %v1962_v23 = vpop.f32.mrf.mxu1 }
 0x883   :  { %v1963_v24 = vadd.f32 %v2903_v22, %v1962_v23 }
 0x885   :  { %1966 = vst [vmem:[%s3129_s9] sm:$0xff] %v1963_v24 }
 0x88a   :  { %v1964_v25 = vpop.f32.mrf.mxu1 }
 0x88b   :  { %1971 = vsyncpa [#allocation6], 1 }
 0x88c   :  { %1972 = vsyncmov [#allocation4] }
 0x88f   :  { %s1973_s6 = vpop.sfrf %1972 }
 0x890   :  { %p2705_p0 = scmp.ne.s32.totalorder %s1973_s6, 0 }
 0x892   :  { %1977 = shalt.err (%p2705_p0)  }
 0x893   :  { %1979 = vsyncmov [#allocation4 + $0x1] }
 0x896   :  { %s1980_s10 = vpop.sfrf %1979 }
 0x897   :  { %p2706_p1 = scmp.ne.s32.totalorder %s1980_s10, 0 }
 0x899   :  { %1984 = shalt.err (%p2706_p1)  }

</bundles_post_ra>
